<compile_context>
chip_gen: v7x
topology: tpu7x:2x2x1
jax: 0.10.0
libtpu: 0.0.40
codegen_flags: <defaults>
</compile_context>

<pallas_src>
import jax
import jax.numpy as jnp
from jax import lax
from jax.experimental import pallas as pl
from jax.experimental.pallas import tpu as pltpu

# ----------------------------- model config ---------------------------------
BATCH = 2
SEQ = 8              # stands in for MAX_CLIP_SEQ_LEN = 77 (small synthetic size)
VOCAB = 128
D_MODEL = 32
N_HEADS = 4
D_HEAD = D_MODEL // N_HEADS
N_LAYERS = 2
D_MLP = 4 * D_MODEL  # = 128
D_PROJ = 32          # CLIP text-projection / embed dim
LN_EPS = 1e-5

LANE = 128
D_PAD = LANE         # hidden width padded to lane width
D_PROJ_PAD = LANE    # projection width padded to lane width
NEG_INF = -1e30      # finite masked value (NaN-safe)


# ------------------------------ fused kernel ---------------------------------
def _encoder_kernel(eot_ref,                      # SMEM prefetch: (B,) flattened EOT row ids
                    x_emb_ref,                    # (B*S, D_PAD) token+pos embedding, f32
                    mask_ref,                     # (H*B*S, B*S) additive block-causal mask
                    colmask_ref,                  # (1, D_PAD) 1.0 on real cols, 0.0 on pads
                    ln1_g_ref, ln1_b_ref,         # (1, 1, D_PAD)
                    wqkv_ref, bqkv_ref,           # (1, D_PAD, 3*D_MODEL) bf16 / (1, 1, 3*D_MODEL)
                    wo_ref, bo_ref,               # (1, D_MODEL, D_PAD) bf16 / (1, 1, D_PAD)
                    ln2_g_ref, ln2_b_ref,         # (1, 1, D_PAD)
                    wfc_ref, bfc_ref,             # (1, D_PAD, D_MLP) bf16 / (1, 1, D_MLP)
                    wpr_ref, bpr_ref,             # (1, D_MLP, D_PAD) bf16 / (1, 1, D_PAD)
                    lnf_g_ref, lnf_b_ref,         # (1, D_PAD)
                    wtp_ref,                      # (D_PAD, D_PROJ_PAD) bf16
                    z_ref,                        # out: (B, D_PROJ_PAD)
                    x_s):                         # VMEM scratch: (B*S, D_PAD), layer-resident
    l = pl.program_id(0)
    f32 = jnp.float32
    M = x_s.shape[0]
    B = z_ref.shape[0]
    H, DH = N_HEADS, D_HEAD

    # First grid step: load the (whole-batch) embedding into the resident scratch.
    @pl.when(l == 0)
    def _():
        x_s[...] = x_emb_ref[...]

    x = x_s[...]                                                   # (M, D_PAD)
    colmask = colmask_ref[...]                                     # (1, D_PAD)

    def ln(xx, g, b):
        # Two-pass LayerNorm over the real D_MODEL columns of a (rows, D_PAD)
        # tile.  `colmask` zeroes the padded lanes so the centered sum of
        # squares over D_PAD equals the sum over D_MODEL, and padded output
        # columns stay exactly zero (padded gamma/beta are zero).
        mean = jnp.sum(xx, axis=-1, keepdims=True) * (1.0 / D_MODEL)
        xm = (xx - mean) * colmask
        var = jnp.sum(xm * xm, axis=-1, keepdims=True) * (1.0 / D_MODEL)
        return xm * lax.rsqrt(var + LN_EPS) * g + b

    # ---------------- attention block: x += W_o . attn(LN1(x)) ----------------
    h1 = ln(x, ln1_g_ref[0], ln1_b_ref[0])

    # Single fused QKV projection (1/sqrt(d_head) folded into the Q columns).
    qkv = jnp.dot(h1, wqkv_ref[0].astype(f32),
                  preferred_element_type=f32) + bqkv_ref[0]        # (M, 3*H*DH)

    # Per-head scores stacked along sublanes -> ONE fused softmax for all heads.
    s_heads = []
    for h in range(H):
        qh = qkv[:, DH * h:DH * (h + 1)]                           # (M, DH)
        kh = qkv[:, DH * (H + h):DH * (H + h + 1)]                 # (M, DH)
        s_heads.append(jnp.einsum("qd,kd->qk", qh, kh,
                                  preferred_element_type=f32))     # (M, M)
    s = jnp.concatenate(s_heads, axis=0) + mask_ref[...]           # (H*M, M)
    mrow = jnp.max(s, axis=-1, keepdims=True)
    p = jnp.exp(s - mrow)
    p = p * pl.reciprocal(jnp.sum(p, axis=-1, keepdims=True), approx=True)

    # Per-head P@V, heads concatenated along lanes, then ONE output projection.
    o_heads = []
    for h in range(H):
        vh = qkv[:, DH * (2 * H + h):DH * (2 * H + h + 1)]         # (M, DH)
        o_heads.append(jnp.dot(p[M * h:M * (h + 1), :], vh,
                               preferred_element_type=f32))        # (M, DH)
    o = jnp.concatenate(o_heads, axis=-1)                          # (M, H*DH)
    x = x + jnp.dot(o, wo_ref[0].astype(f32),
                    preferred_element_type=f32) + bo_ref[0]

    # ---------------- MLP block: x += W_pr . quick_gelu(W_fc . LN2(x)) --------
    h2 = ln(x, ln2_g_ref[0], ln2_b_ref[0])
    f = jnp.dot(h2, wfc_ref[0].astype(f32), preferred_element_type=f32) + bfc_ref[0]
    f = f * jax.nn.sigmoid(1.702 * f)                              # CLIP QuickGELU
    x = x + jnp.dot(f, wpr_ref[0].astype(f32), preferred_element_type=f32) + bpr_ref[0]

    x_s[...] = x

    # ------ last layer: ln_final -> EOT pool -> text projection -> L2 norm -----
    @pl.when(l == pl.num_programs(0) - 1)
    def _():
        xf = ln(x, lnf_g_ref[...], lnf_b_ref[...])                 # (M, D_PAD)
        cols = lax.broadcasted_iota(jnp.int32, (1, M), 1)
        sel = jnp.concatenate(
            [(cols == eot_ref[b]).astype(f32) for b in range(B)], axis=0)  # (B, M)
        pooled = jnp.dot(sel, xf, preferred_element_type=f32)      # (B, D_PAD)
        z = jnp.dot(pooled, wtp_ref[...].astype(f32),
                    preferred_element_type=f32)                    # (B, D_PROJ_PAD)
        ssq = jnp.sum(z * z, axis=-1, keepdims=True)               # padded cols are 0
        z_ref[...] = z * lax.rsqrt(ssq)


# ------------------------------ kernel wrapper --------------------------------
def clip_encode_text(packed, tokens):
    """Fused equivalent of clip_model.encode_text(tokens) followed by L2 norm."""
    B, S = tokens.shape
    M = B * S
    L = packed["w_qkv"].shape[0]
    Dp = packed["tok_emb"].shape[-1]

    # Glue (plain XLA): embedding-table gather + positional add, EOT positions.
    # NOTE: EOT pooling via argmax(tokens) assumes the EOT token has the
    # maximum id (CLIP tokenizer invariant).
    x_emb = (packed["tok_emb"][tokens] + packed["pos_emb"][None, :S, :]).reshape(M, Dp)
    eot_flat = (jnp.arange(B, dtype=jnp.int32) * S
                + jnp.argmax(tokens, axis=-1).astype(jnp.int32))   # flattened EOT row ids

    # Constant masks, fetched once (constant index_map -> no per-layer refetch).
    idx = jnp.arange(M)
    same_batch = (idx[:, None] // S) == (idx[None, :] // S)
    causal = idx[None, :] <= idx[:, None]
    base = jnp.where(same_batch & causal, 0.0, NEG_INF).astype(jnp.float32)   # (M, M)
    mask = jnp.tile(base, (N_HEADS, 1))                                       # (H*M, M)
    colmask = (jnp.arange(Dp) < D_MODEL).astype(jnp.float32)[None, :]         # (1, Dp)

    cmap = lambda l, eot: (0, 0)          # fetched once, resident across all layers
    lmap = lambda l, eot: (l, 0, 0)       # per-layer weight tile (double-buffered)

    grid_spec = pltpu.PrefetchScalarGridSpec(
        num_scalar_prefetch=1,
        grid=(L,),
        in_specs=[
            pl.BlockSpec((M, Dp), cmap),                       # x_emb
            pl.BlockSpec((N_HEADS * M, M), cmap),              # block-causal mask
            pl.BlockSpec((1, Dp), cmap),                       # colmask
            pl.BlockSpec((1, 1, Dp), lmap),                    # ln1_g
            pl.BlockSpec((1, 1, Dp), lmap),                    # ln1_b
            pl.BlockSpec((1, Dp, 3 * D_MODEL), lmap),          # w_qkv (bf16)
            pl.BlockSpec((1, 1, 3 * D_MODEL), lmap),           # b_qkv
            pl.BlockSpec((1, D_MODEL, Dp), lmap),              # w_o   (bf16)
            pl.BlockSpec((1, 1, Dp), lmap),                    # b_o
            pl.BlockSpec((1, 1, Dp), lmap),                    # ln2_g
            pl.BlockSpec((1, 1, Dp), lmap),                    # ln2_b
            pl.BlockSpec((1, Dp, D_MLP), lmap),                # w_fc  (bf16)
            pl.BlockSpec((1, 1, D_MLP), lmap),                 # b_fc
            pl.BlockSpec((1, D_MLP, Dp), lmap),                # w_pr  (bf16)
            pl.BlockSpec((1, 1, Dp), lmap),                    # b_pr
            pl.BlockSpec((1, Dp), cmap),                       # lnf_g
            pl.BlockSpec((1, Dp), cmap),                       # lnf_b
            pl.BlockSpec((Dp, D_PROJ_PAD), cmap),              # w_tp  (bf16)
        ],
        out_specs=pl.BlockSpec((B, D_PROJ_PAD), cmap),
        scratch_shapes=[pltpu.VMEM((M, Dp), jnp.float32)],
    )

    z = pl.pallas_call(
        _encoder_kernel,
        out_shape=jax.ShapeDtypeStruct((B, D_PROJ_PAD), jnp.float32),
        grid_spec=grid_spec,
        compiler_params=pltpu.CompilerParams(
            dimension_semantics=("arbitrary",),       # layer axis carries the activation
            vmem_limit_bytes=32 * 1024 * 1024),
    )(eot_flat, x_emb, mask, colmask,
      packed["ln1_g"], packed["ln1_b"], packed["w_qkv"], packed["b_qkv"],
      packed["w_o"], packed["b_o"], packed["ln2_g"], packed["ln2_b"],
      packed["w_fc"], packed["b_fc"], packed["w_pr"], packed["b_pr"],
      packed["lnf_g"], packed["lnf_b"], packed["w_tp"])

    return z[:, :D_PROJ]


# ----------------------------- parameter init ---------------------------------
def init_params(key):
    keys = iter(jax.random.split(key, 8 + 10 * N_LAYERS))
    nk = lambda: next(keys)
    p = {
        "token_embedding": 0.02 * jax.random.normal(nk(), (VOCAB, D_MODEL), jnp.float32),
        "positional_embedding": 0.01 * jax.random.normal(nk(), (SEQ, D_MODEL), jnp.float32),
        "ln_final_g": jnp.ones((D_MODEL,), jnp.float32),
        "ln_final_b": jnp.zeros((D_MODEL,), jnp.float32),
        "text_projection": (D_MODEL ** -0.5)
        * jax.random.normal(nk(), (D_MODEL, D_PROJ), jnp.float32),
        "layers": [],
    }
    for _ in range(N_LAYERS):
        layer = {
            "ln1_g": jnp.ones((D_MODEL,), jnp.float32),
            "ln1_b": jnp.zeros((D_MODEL,), jnp.float32),
            "w_qkv": (D_MODEL ** -0.5) * jax.random.normal(nk(), (D_MODEL, 3 * D_MODEL), jnp.float32),
            "b_qkv": jnp.zeros((3 * D_MODEL,), jnp.float32),
            "w_out": (D_MODEL ** -0.5) * jax.random.normal(nk(), (D_MODEL, D_MODEL), jnp.float32),
            "b_out": jnp.zeros((D_MODEL,), jnp.float32),
            "ln2_g": jnp.ones((D_MODEL,), jnp.float32),
            "ln2_b": jnp.zeros((D_MODEL,), jnp.float32),
            "w_fc": (D_MODEL ** -0.5) * jax.random.normal(nk(), (D_MODEL, D_MLP), jnp.float32),
            "b_fc": jnp.zeros((D_MLP,), jnp.float32),
            "w_proj": (D_MLP ** -0.5) * jax.random.normal(nk(), (D_MLP, D_MODEL), jnp.float32),
            "b_proj": jnp.zeros((D_MODEL,), jnp.float32),
        }
        p["layers"].append(layer)
    return p


def pack_params(p):
    """Pad feature dims to the 128-lane width, keep the fused QKV layout, fold
    the 1/sqrt(d_head) scale into the Q columns, stack per-layer weights along a
    leading layer axis, and store the big weight matrices in bf16 (halves their
    HBM DMA bytes and double-buffered VMEM footprint)."""
    scale = D_HEAD ** -0.5
    pad_d = D_PAD - D_MODEL
    bf16 = jnp.bfloat16
    layers = p["layers"]

    def vec(v):                                    # (D_MODEL,) -> (1, D_PAD)
        return jnp.pad(v, (0, pad_d))[None, :]

    def qkv_w(l):                                  # (D, 3D) -> (D_PAD, 3D), Q cols scaled
        w = l["w_qkv"]
        w = jnp.concatenate([w[:, :D_MODEL] * scale, w[:, D_MODEL:]], axis=1)
        return jnp.pad(w, ((0, pad_d), (0, 0)))

    def qkv_b(l):                                  # (3D,) -> (1, 3D), Q part scaled
        b = l["b_qkv"]
        return jnp.concatenate([b[:D_MODEL] * scale, b[D_MODEL:]])[None, :]

    packed = {
        "tok_emb": jnp.pad(p["token_embedding"], ((0, 0), (0, pad_d))),
        "pos_emb": jnp.pad(p["positional_embedding"], ((0, 0), (0, pad_d))),
        "lnf_g": vec(p["ln_final_g"]),
        "lnf_b": vec(p["ln_final_b"]),
        "w_tp": jnp.pad(p["text_projection"],
                        ((0, pad_d), (0, D_PROJ_PAD - D_PROJ))).astype(bf16),
        "ln1_g": jnp.stack([vec(l["ln1_g"]) for l in layers]),
        "ln1_b": jnp.stack([vec(l["ln1_b"]) for l in layers]),
        "w_qkv": jnp.stack([qkv_w(l) for l in layers]).astype(bf16),
        "b_qkv": jnp.stack([qkv_b(l) for l in layers]),
        "w_o": jnp.stack([jnp.pad(l["w_out"], ((0, 0), (0, pad_d))) for l in layers]).astype(bf16),
        "b_o": jnp.stack([vec(l["b_out"]) for l in layers]),
        "ln2_g": jnp.stack([vec(l["ln2_g"]) for l in layers]),
        "ln2_b": jnp.stack([vec(l["ln2_b"]) for l in layers]),
        "w_fc": jnp.stack([jnp.pad(l["w_fc"], ((0, pad_d), (0, 0))) for l in layers]).astype(bf16),
        "b_fc": jnp.stack([l["b_fc"][None, :] for l in layers]),
        "w_pr": jnp.stack([jnp.pad(l["w_proj"], ((0, 0), (0, pad_d))) for l in layers]).astype(bf16),
        "b_pr": jnp.stack([vec(l["b_proj"]) for l in layers]),
    }
    return packed


# --------------------------- pure-JAX reference --------------------------------
def _quick_gelu(x):
    return x * jax.nn.sigmoid(1.702 * x)


def _ln_ref(x, g, b):
    m = jnp.mean(x, axis=-1, keepdims=True)
    v = jnp.mean((x - m) ** 2, axis=-1, keepdims=True)
    return (x - m) * lax.rsqrt(v + LN_EPS) * g + b


def reference_forward(params, tokens):
    """Unfused pure-JAX reference of FrozenCLIPTextEmbedder.forward (normalize=True)."""
    B, S = tokens.shape
    x = params["token_embedding"][tokens] + params["positional_embedding"][None, :S, :]
    scale = D_HEAD ** -0.5
    mask = jnp.where(jnp.arange(S)[None, :] <= jnp.arange(S)[:, None], 0.0, NEG_INF)
    for layer in params["layers"]:
        h = _ln_ref(x, layer["ln1_g"], layer["ln1_b"])
        qkv = h @ layer["w_qkv"] + layer["b_qkv"]
        q, k, v = jnp.split(qkv, 3, axis=-1)
        q = q.reshape(B, S, N_HEADS, D_HEAD).transpose(0, 2, 1, 3) * scale
        k = k.reshape(B, S, N_HEADS, D_HEAD).transpose(0, 2, 1, 3)
        v = v.reshape(B, S, N_HEADS, D_HEAD).transpose(0, 2, 1, 3)
        s = jnp.einsum("bhqd,bhkd->bhqk", q, k) + mask
        p = jax.nn.softmax(s, axis=-1)
        o = jnp.einsum("bhqk,bhkd->bhqd", p, v)
        o = o.transpose(0, 2, 1, 3).reshape(B, S, D_MODEL)
        x = x + o @ layer["w_out"] + layer["b_out"]
        h = _ln_ref(x, layer["ln2_g"], layer["ln2_b"])
        x = x + _quick_gelu(h @ layer["w_fc"] + layer["b_fc"]) @ layer["w_proj"] + layer["b_proj"]
    x = _ln_ref(x, params["ln_final_g"], params["ln_final_b"])
    pooled = x[jnp.arange(B), jnp.argmax(tokens, axis=-1)]
    z = pooled @ params["text_projection"]
    return z / jnp.linalg.norm(z, axis=1, keepdims=True)


# ----------------------------------- main ---------------------------------------
if __name__ == "__main__":
    key = jax.random.PRNGKey(0)
    pkey, tkey = jax.random.split(key)
    params = init_params(pkey)
    packed = pack_params(params)

    # Synthetic "tokenized text": random ids with an EOT (= VOCAB-1, the max id —
    # CLIP's tokenizer invariant for argmax pooling) at a known position per row.
    # TODO(synk): clip.tokenize (BPE text tokenizer) has no Pallas equivalent.
    tokens = jax.random.randint(tkey, (BATCH, SEQ), 1, VOCAB - 2, dtype=jnp.int32)
    eot_positions = jnp.array([5, 7], dtype=jnp.int32)
    tokens = tokens.at[jnp.arange(BATCH), eot_positions].set(VOCAB - 1)

    z = jax.jit(clip_encode_text)(packed, tokens)
    z = jax.block_until_ready(z)

    assert z.shape == (BATCH, D_PROJ) and z.dtype == jnp.float32
    # output rows are unit-norm after the in-kernel normalization
    norms = jnp.linalg.norm(z, axis=1)
    assert bool(jnp.all(jnp.abs(norms - 1.0) < 1e-3))
    # matches the unfused pure-JAX f32 reference (kernel uses bf16 weights +
    # approx softmax reciprocal, hence the loose tolerance)
    z_ref = reference_forward(params, tokens)
    assert bool(jnp.allclose(z, z_ref, atol=3e-2, rtol=3e-2)), float(jnp.max(jnp.abs(z - z_ref)))
    print("KERNEL_OK")
</pallas_src>

<mosaic_0001>
module attributes {stable_mosaic.version = 11 : i64} {
  func.func @_encoder_kernel(%arg0: i32, %arg1: memref<2xi32, #tpu.memory_space<smem>>, %arg2: memref<16x128xf32, #tpu.memory_space<vmem>>, %arg3: memref<64x16xf32, #tpu.memory_space<vmem>>, %arg4: memref<1x128xf32, #tpu.memory_space<vmem>>, %arg5: memref<1x1x128xf32, #tpu.memory_space<vmem>>, %arg6: memref<1x1x128xf32, #tpu.memory_space<vmem>>, %arg7: memref<1x128x96xbf16, #tpu.memory_space<vmem>>, %arg8: memref<1x1x96xf32, #tpu.memory_space<vmem>>, %arg9: memref<1x32x128xbf16, #tpu.memory_space<vmem>>, %arg10: memref<1x1x128xf32, #tpu.memory_space<vmem>>, %arg11: memref<1x1x128xf32, #tpu.memory_space<vmem>>, %arg12: memref<1x1x128xf32, #tpu.memory_space<vmem>>, %arg13: memref<1x128x128xbf16, #tpu.memory_space<vmem>>, %arg14: memref<1x1x128xf32, #tpu.memory_space<vmem>>, %arg15: memref<1x128x128xbf16, #tpu.memory_space<vmem>>, %arg16: memref<1x1x128xf32, #tpu.memory_space<vmem>>, %arg17: memref<1x128xf32, #tpu.memory_space<vmem>>, %arg18: memref<1x128xf32, #tpu.memory_space<vmem>>, %arg19: memref<128x128xbf16, #tpu.memory_space<vmem>>, %arg20: memref<2x128xf32, #tpu.memory_space<vmem>>, %arg21: memref<16x128xf32, #tpu.memory_space<vmem>>) attributes {dimension_semantics = [#tpu.dimension_semantics<arbitrary>], iteration_bounds = array<i64: 2>, scalar_prefetch = 1 : i64, scratch_operands = 1 : i64, tpu.core_type = #tpu.core_type<tc>, window_params = [{pipeline_mode = #tpu.pipeline_mode<synchronous>, transform_indices = @transform_0, window_bounds = array<i64: 16, 128>}, {pipeline_mode = #tpu.pipeline_mode<synchronous>, transform_indices = @transform_1, window_bounds = array<i64: 64, 16>}, {pipeline_mode = #tpu.pipeline_mode<synchronous>, transform_indices = @transform_2, window_bounds = array<i64: 1, 128>}, {transform_indices = @transform_3, window_bounds = array<i64: 1, 1, 128>}, {transform_indices = @transform_4, window_bounds = array<i64: 1, 1, 128>}, {transform_indices = @transform_5, window_bounds = array<i64: 1, 128, 96>}, {transform_indices = @transform_6, window_bounds = array<i64: 1, 1, 96>}, {transform_indices = @transform_7, window_bounds = array<i64: 1, 32, 128>}, {transform_indices = @transform_8, window_bounds = array<i64: 1, 1, 128>}, {transform_indices = @transform_9, window_bounds = array<i64: 1, 1, 128>}, {transform_indices = @transform_10, window_bounds = array<i64: 1, 1, 128>}, {transform_indices = @transform_11, window_bounds = array<i64: 1, 128, 128>}, {transform_indices = @transform_12, window_bounds = array<i64: 1, 1, 128>}, {transform_indices = @transform_13, window_bounds = array<i64: 1, 128, 128>}, {transform_indices = @transform_14, window_bounds = array<i64: 1, 1, 128>}, {pipeline_mode = #tpu.pipeline_mode<synchronous>, transform_indices = @transform_15, window_bounds = array<i64: 1, 128>}, {pipeline_mode = #tpu.pipeline_mode<synchronous>, transform_indices = @transform_16, window_bounds = array<i64: 1, 128>}, {pipeline_mode = #tpu.pipeline_mode<synchronous>, transform_indices = @transform_17, window_bounds = array<i64: 128, 128>}, {pipeline_mode = #tpu.pipeline_mode<synchronous>, transform_indices = @transform_18, window_bounds = array<i64: 2, 128>}]} {
    %c0_i32 = arith.constant 0 : i32
    %0 = arith.cmpi eq, %arg0, %c0_i32 : i32
    %1 = arith.extui %0 : i1 to i32
    %c0_i32_0 = arith.constant 0 : i32
    %2 = arith.cmpi ne, %1, %c0_i32_0 : i32
    scf.if %2 {
      %c0_70 = arith.constant 0 : index
      %c0_71 = arith.constant 0 : index
      %141 = vector.load %arg2[%c0_70, %c0_71] : memref<16x128xf32, #tpu.memory_space<vmem>>, vector<16x128xf32>
      %c0_72 = arith.constant 0 : index
      %c0_73 = arith.constant 0 : index
      %142 = vector.load %arg21[%c0_72, %c0_73] : memref<16x128xf32, #tpu.memory_space<vmem>>, vector<16x128xf32>
      tpu.vector_store %arg21[%c0_72, %c0_73], %141 {strides = array<i32>} : memref<16x128xf32, #tpu.memory_space<vmem>>, vector<16x128xf32>,
    } else {
    }
    %c0 = arith.constant 0 : index
    %c0_1 = arith.constant 0 : index
    %3 = vector.load %arg21[%c0, %c0_1] : memref<16x128xf32, #tpu.memory_space<vmem>>, vector<16x128xf32>
    %c0_2 = arith.constant 0 : index
    %c0_3 = arith.constant 0 : index
    %4 = vector.load %arg4[%c0_2, %c0_3] : memref<1x128xf32, #tpu.memory_space<vmem>>, vector<1x128xf32>
    %c0_4 = arith.constant 0 : index
    %c0_5 = arith.constant 0 : index
    %c0_6 = arith.constant 0 : index
    %5 = vector.load %arg5[%c0_4, %c0_5, %c0_6] : memref<1x1x128xf32, #tpu.memory_space<vmem>>, vector<1x1x128xf32>
    %6 = vector.shape_cast %5 : vector<1x1x128xf32> to vector<1x128xf32>
    %c0_7 = arith.constant 0 : index
    %c0_8 = arith.constant 0 : index
    %c0_9 = arith.constant 0 : index
    %7 = vector.load %arg6[%c0_7, %c0_8, %c0_9] : memref<1x1x128xf32, #tpu.memory_space<vmem>>, vector<1x1x128xf32>
    %8 = vector.shape_cast %7 : vector<1x1x128xf32> to vector<1x128xf32>
    %cst = arith.constant dense<0.000000e+00> : vector<16xf32>
    %9 = vector.multi_reduction <add>, %3, %cst [1] : vector<16x128xf32> to vector<16xf32>
    %10 = vector.shape_cast %9 : vector<16xf32> to vector<16x1xf32>
    %cst_10 = arith.constant 3.125000e-02 : f32
    %11 = vector.broadcast %cst_10 : f32 to vector<16x1xf32>
    %12 = arith.mulf %10, %11 : vector<16x1xf32>
    %13 = vector.broadcast %12 : vector<16x1xf32> to vector<16x128xf32>
    %14 = arith.subf %3, %13 : vector<16x128xf32>
    %15 = vector.broadcast %4 : vector<1x128xf32> to vector<16x128xf32>
    %16 = arith.mulf %14, %15 : vector<16x128xf32>
    %17 = arith.mulf %16, %16 : vector<16x128xf32>
    %cst_11 = arith.constant dense<0.000000e+00> : vector<16xf32>
    %18 = vector.multi_reduction <add>, %17, %cst_11 [1] : vector<16x128xf32> to vector<16xf32>
    %19 = vector.shape_cast %18 : vector<16xf32> to vector<16x1xf32>
    %cst_12 = arith.constant 3.125000e-02 : f32
    %20 = vector.broadcast %cst_12 : f32 to vector<16x1xf32>
    %21 = arith.mulf %19, %20 : vector<16x1xf32>
    %cst_13 = arith.constant 9.99999974E-6 : f32
    %22 = vector.broadcast %cst_13 : f32 to vector<16x1xf32>
    %23 = arith.addf %21, %22 : vector<16x1xf32>
    %24 = math.rsqrt %23 : vector<16x1xf32>
    %25 = vector.broadcast %24 : vector<16x1xf32> to vector<16x128xf32>
    %26 = arith.mulf %16, %25 : vector<16x128xf32>
    %27 = vector.broadcast %6 : vector<1x128xf32> to vector<16x128xf32>
    %28 = arith.mulf %26, %27 : vector<16x128xf32>
    %29 = vector.broadcast %8 : vector<1x128xf32> to vector<16x128xf32>
    %30 = arith.addf %28, %29 : vector<16x128xf32>
    %c0_14 = arith.constant 0 : index
    %c0_15 = arith.constant 0 : index
    %c0_16 = arith.constant 0 : index
    %31 = vector.load %arg7[%c0_14, %c0_15, %c0_16] : memref<1x128x96xbf16, #tpu.memory_space<vmem>>, vector<1x128x96xbf16>
    %32 = vector.shape_cast %31 : vector<1x128x96xbf16> to vector<128x96xbf16>
    %33 = arith.extf %32 : vector<128x96xbf16> to vector<128x96xf32>
    %cst_17 = arith.constant dense<0.000000e+00> : vector<16x96xf32>
    %34 = tpu.matmul %30, %33, %cst_17 {dimension_numbers = #tpu.dot_dimension_numbers<[1], [0], [0], [1], [0, 0, 1, 1], [], []>} : vector<16x128xf32>, vector<128x96xf32>, vector<16x96xf32> -> vector<16x96xf32>
    %c0_18 = arith.constant 0 : index
    %c0_19 = arith.constant 0 : index
    %c0_20 = arith.constant 0 : index
    %35 = vector.load %arg8[%c0_18, %c0_19, %c0_20] : memref<1x1x96xf32, #tpu.memory_space<vmem>>, vector<1x1x96xf32>
    %36 = vector.shape_cast %35 : vector<1x1x96xf32> to vector<1x96xf32>
    %37 = vector.broadcast %36 : vector<1x96xf32> to vector<16x96xf32>
    %38 = arith.addf %34, %37 : vector<16x96xf32>
    %39 = vector.extract_strided_slice %38 {offsets = [0, 0], sizes = [16, 8], strides = [1, 1]} : vector<16x96xf32> to vector<16x8xf32>
    %40 = vector.extract_strided_slice %38 {offsets = [0, 32], sizes = [16, 8], strides = [1, 1]} : vector<16x96xf32> to vector<16x8xf32>
    "tpu.trace_start"() <{level = 10 : i32, message = "qd,kd->qk"}> : () -> ()
    %cst_21 = arith.constant dense<0.000000e+00> : vector<16x16xf32>
    %41 = tpu.matmul %39, %40, %cst_21 {dimension_numbers = #tpu.dot_dimension_numbers<[1], [1], [0], [0], [0, 0, 1, 0], [], []>} : vector<16x8xf32>, vector<16x8xf32>, vector<16x16xf32> -> vector<16x16xf32>
    "tpu.trace_stop"() : () -> ()
    %42 = vector.extract_strided_slice %38 {offsets = [0, 8], sizes = [16, 8], strides = [1, 1]} : vector<16x96xf32> to vector<16x8xf32>
    %43 = vector.extract_strided_slice %38 {offsets = [0, 40], sizes = [16, 8], strides = [1, 1]} : vector<16x96xf32> to vector<16x8xf32>
    "tpu.trace_start"() <{level = 10 : i32, message = "qd,kd->qk"}> : () -> ()
    %cst_22 = arith.constant dense<0.000000e+00> : vector<16x16xf32>
    %44 = tpu.matmul %42, %43, %cst_22 {dimension_numbers = #tpu.dot_dimension_numbers<[1], [1], [0], [0], [0, 0, 1, 0], [], []>} : vector<16x8xf32>, vector<16x8xf32>, vector<16x16xf32> -> vector<16x16xf32>
    "tpu.trace_stop"() : () -> ()
    %45 = vector.extract_strided_slice %38 {offsets = [0, 16], sizes = [16, 8], strides = [1, 1]} : vector<16x96xf32> to vector<16x8xf32>
    %46 = vector.extract_strided_slice %38 {offsets = [0, 48], sizes = [16, 8], strides = [1, 1]} : vector<16x96xf32> to vector<16x8xf32>
    "tpu.trace_start"() <{level = 10 : i32, message = "qd,kd->qk"}> : () -> ()
    %cst_23 = arith.constant dense<0.000000e+00> : vector<16x16xf32>
    %47 = tpu.matmul %45, %46, %cst_23 {dimension_numbers = #tpu.dot_dimension_numbers<[1], [1], [0], [0], [0, 0, 1, 0], [], []>} : vector<16x8xf32>, vector<16x8xf32>, vector<16x16xf32> -> vector<16x16xf32>
    "tpu.trace_stop"() : () -> ()
    %48 = vector.extract_strided_slice %38 {offsets = [0, 24], sizes = [16, 8], strides = [1, 1]} : vector<16x96xf32> to vector<16x8xf32>
    %49 = vector.extract_strided_slice %38 {offsets = [0, 56], sizes = [16, 8], strides = [1, 1]} : vector<16x96xf32> to vector<16x8xf32>
    "tpu.trace_start"() <{level = 10 : i32, message = "qd,kd->qk"}> : () -> ()
    %cst_24 = arith.constant dense<0.000000e+00> : vector<16x16xf32>
    %50 = tpu.matmul %48, %49, %cst_24 {dimension_numbers = #tpu.dot_dimension_numbers<[1], [1], [0], [0], [0, 0, 1, 0], [], []>} : vector<16x8xf32>, vector<16x8xf32>, vector<16x16xf32> -> vector<16x16xf32>
    "tpu.trace_stop"() : () -> ()
    %51 = tpu.concatenate %41, %44, %47, %50 in 0 : vector<16x16xf32>, vector<16x16xf32>, vector<16x16xf32>, vector<16x16xf32> -> vector<64x16xf32>
    %c0_25 = arith.constant 0 : index
    %c0_26 = arith.constant 0 : index
    %52 = vector.load %arg3[%c0_25, %c0_26] : memref<64x16xf32, #tpu.memory_space<vmem>>, vector<64x16xf32>
    %53 = arith.addf %51, %52 : vector<64x16xf32>
    %cst_27 = arith.constant dense<0xFF800000> : vector<64xf32>
    %54 = vector.multi_reduction <maximumf>, %53, %cst_27 [1] : vector<64x16xf32> to vector<64xf32>
    %55 = vector.shape_cast %54 : vector<64xf32> to vector<64x1xf32>
    %56 = vector.broadcast %55 : vector<64x1xf32> to vector<64x16xf32>
    %57 = arith.subf %53, %56 : vector<64x16xf32>
    %58 = math.exp %57 : vector<64x16xf32>
    %cst_28 = arith.constant dense<0.000000e+00> : vector<64xf32>
    %59 = vector.multi_reduction <add>, %58, %cst_28 [1] : vector<64x16xf32> to vector<64xf32>
    %60 = vector.shape_cast %59 : vector<64xf32> to vector<64x1xf32>
    %61 = tpu.reciprocal %60 {approx = true} : vector<64x1xf32> -> vector<64x1xf32>
    %62 = vector.broadcast %61 : vector<64x1xf32> to vector<64x16xf32>
    %63 = arith.mulf %58, %62 : vector<64x16xf32>
    %64 = vector.extract_strided_slice %38 {offsets = [0, 64], sizes = [16, 8], strides = [1, 1]} : vector<16x96xf32> to vector<16x8xf32>
    %65 = vector.extract_strided_slice %63 {offsets = [0, 0], sizes = [16, 16], strides = [1, 1]} : vector<64x16xf32> to vector<16x16xf32>
    %cst_29 = arith.constant dense<0.000000e+00> : vector<16x8xf32>
    %66 = tpu.matmul %65, %64, %cst_29 {dimension_numbers = #tpu.dot_dimension_numbers<[1], [0], [0], [1], [0, 0, 1, 1], [], []>} : vector<16x16xf32>, vector<16x8xf32>, vector<16x8xf32> -> vector<16x8xf32>
    %67 = vector.extract_strided_slice %38 {offsets = [0, 72], sizes = [16, 8], strides = [1, 1]} : vector<16x96xf32> to vector<16x8xf32>
    %68 = vector.extract_strided_slice %63 {offsets = [16, 0], sizes = [16, 16], strides = [1, 1]} : vector<64x16xf32> to vector<16x16xf32>
    %cst_30 = arith.constant dense<0.000000e+00> : vector<16x8xf32>
    %69 = tpu.matmul %68, %67, %cst_30 {dimension_numbers = #tpu.dot_dimension_numbers<[1], [0], [0], [1], [0, 0, 1, 1], [], []>} : vector<16x16xf32>, vector<16x8xf32>, vector<16x8xf32> -> vector<16x8xf32>
    %70 = vector.extract_strided_slice %38 {offsets = [0, 80], sizes = [16, 8], strides = [1, 1]} : vector<16x96xf32> to vector<16x8xf32>
    %71 = vector.extract_strided_slice %63 {offsets = [32, 0], sizes = [16, 16], strides = [1, 1]} : vector<64x16xf32> to vector<16x16xf32>
    %cst_31 = arith.constant dense<0.000000e+00> : vector<16x8xf32>
    %72 = tpu.matmul %71, %70, %cst_31 {dimension_numbers = #tpu.dot_dimension_numbers<[1], [0], [0], [1], [0, 0, 1, 1], [], []>} : vector<16x16xf32>, vector<16x8xf32>, vector<16x8xf32> -> vector<16x8xf32>
    %73 = vector.extract_strided_slice %38 {offsets = [0, 88], sizes = [16, 8], strides = [1, 1]} : vector<16x96xf32> to vector<16x8xf32>
    %74 = vector.extract_strided_slice %63 {offsets = [48, 0], sizes = [16, 16], strides = [1, 1]} : vector<64x16xf32> to vector<16x16xf32>
    %cst_32 = arith.constant dense<0.000000e+00> : vector<16x8xf32>
    %75 = tpu.matmul %74, %73, %cst_32 {dimension_numbers = #tpu.dot_dimension_numbers<[1], [0], [0], [1], [0, 0, 1, 1], [], []>} : vector<16x16xf32>, vector<16x8xf32>, vector<16x8xf32> -> vector<16x8xf32>
    %76 = tpu.concatenate %66, %69, %72, %75 in 1 : vector<16x8xf32>, vector<16x8xf32>, vector<16x8xf32>, vector<16x8xf32> -> vector<16x32xf32>
    %c0_33 = arith.constant 0 : index
    %c0_34 = arith.constant 0 : index
    %c0_35 = arith.constant 0 : index
    %77 = vector.load %arg9[%c0_33, %c0_34, %c0_35] : memref<1x32x128xbf16, #tpu.memory_space<vmem>>, vector<1x32x128xbf16>
    %78 = vector.shape_cast %77 : vector<1x32x128xbf16> to vector<32x128xbf16>
    %79 = arith.extf %78 : vector<32x128xbf16> to vector<32x128xf32>
    %cst_36 = arith.constant dense<0.000000e+00> : vector<16x128xf32>
    %80 = tpu.matmul %76, %79, %cst_36 {dimension_numbers = #tpu.dot_dimension_numbers<[1], [0], [0], [1], [0, 0, 1, 1], [], []>} : vector<16x32xf32>, vector<32x128xf32>, vector<16x128xf32> -> vector<16x128xf32>
    %81 = arith.addf %3, %80 : vector<16x128xf32>
    %c0_37 = arith.constant 0 : index
    %c0_38 = arith.constant 0 : index
    %c0_39 = arith.constant 0 : index
    %82 = vector.load %arg10[%c0_37, %c0_38, %c0_39] : memref<1x1x128xf32, #tpu.memory_space<vmem>>, vector<1x1x128xf32>
    %83 = vector.shape_cast %82 : vector<1x1x128xf32> to vector<1x128xf32>
    %84 = vector.broadcast %83 : vector<1x128xf32> to vector<16x128xf32>
    %85 = arith.addf %81, %84 : vector<16x128xf32>
    %c0_40 = arith.constant 0 : index
    %c0_41 = arith.constant 0 : index
    %c0_42 = arith.constant 0 : index
    %86 = vector.load %arg11[%c0_40, %c0_41, %c0_42] : memref<1x1x128xf32, #tpu.memory_space<vmem>>, vector<1x1x128xf32>
    %87 = vector.shape_cast %86 : vector<1x1x128xf32> to vector<1x128xf32>
    %c0_43 = arith.constant 0 : index
    %c0_44 = arith.constant 0 : index
    %c0_45 = arith.constant 0 : index
    %88 = vector.load %arg12[%c0_43, %c0_44, %c0_45] : memref<1x1x128xf32, #tpu.memory_space<vmem>>, vector<1x1x128xf32>
    %89 = vector.shape_cast %88 : vector<1x1x128xf32> to vector<1x128xf32>
    %cst_46 = arith.constant dense<0.000000e+00> : vector<16xf32>
    %90 = vector.multi_reduction <add>, %85, %cst_46 [1] : vector<16x128xf32> to vector<16xf32>
    %91 = vector.shape_cast %90 : vector<16xf32> to vector<16x1xf32>
    %cst_47 = arith.constant 3.125000e-02 : f32
    %92 = vector.broadcast %cst_47 : f32 to vector<16x1xf32>
    %93 = arith.mulf %91, %92 : vector<16x1xf32>
    %94 = vector.broadcast %93 : vector<16x1xf32> to vector<16x128xf32>
    %95 = arith.subf %85, %94 : vector<16x128xf32>
    %96 = vector.broadcast %4 : vector<1x128xf32> to vector<16x128xf32>
    %97 = arith.mulf %95, %96 : vector<16x128xf32>
    %98 = arith.mulf %97, %97 : vector<16x128xf32>
    %cst_48 = arith.constant dense<0.000000e+00> : vector<16xf32>
    %99 = vector.multi_reduction <add>, %98, %cst_48 [1] : vector<16x128xf32> to vector<16xf32>
    %100 = vector.shape_cast %99 : vector<16xf32> to vector<16x1xf32>
    %cst_49 = arith.constant 3.125000e-02 : f32
    %101 = vector.broadcast %cst_49 : f32 to vector<16x1xf32>
    %102 = arith.mulf %100, %101 : vector<16x1xf32>
    %cst_50 = arith.constant 9.99999974E-6 : f32
    %103 = vector.broadcast %cst_50 : f32 to vector<16x1xf32>
    %104 = arith.addf %102, %103 : vector<16x1xf32>
    %105 = math.rsqrt %104 : vector<16x1xf32>
    %106 = vector.broadcast %105 : vector<16x1xf32> to vector<16x128xf32>
    %107 = arith.mulf %97, %106 : vector<16x128xf32>
    %108 = vector.broadcast %87 : vector<1x128xf32> to vector<16x128xf32>
    %109 = arith.mulf %107, %108 : vector<16x128xf32>
    %110 = vector.broadcast %89 : vector<1x128xf32> to vector<16x128xf32>
    %111 = arith.addf %109, %110 : vector<16x128xf32>
    %c0_51 = arith.constant 0 : index
    %c0_52 = arith.constant 0 : index
    %c0_53 = arith.constant 0 : index
    %112 = vector.load %arg13[%c0_51, %c0_52, %c0_53] : memref<1x128x128xbf16, #tpu.memory_space<vmem>>, vector<1x128x128xbf16>
    %113 = vector.shape_cast %112 : vector<1x128x128xbf16> to vector<128x128xbf16>
    %114 = arith.extf %113 : vector<128x128xbf16> to vector<128x128xf32>
    %cst_54 = arith.constant dense<0.000000e+00> : vector<16x128xf32>
    %115 = tpu.matmul %111, %114, %cst_54 {dimension_numbers = #tpu.dot_dimension_numbers<[1], [0], [0], [1], [0, 0, 1, 1], [], []>} : vector<16x128xf32>, vector<128x128xf32>, vector<16x128xf32> -> vector<16x128xf32>
    %c0_55 = arith.constant 0 : index
    %c0_56 = arith.constant 0 : index
    %c0_57 = arith.constant 0 : index
    %116 = vector.load %arg14[%c0_55, %c0_56, %c0_57] : memref<1x1x128xf32, #tpu.memory_space<vmem>>, vector<1x1x128xf32>
    %117 = vector.shape_cast %116 : vector<1x1x128xf32> to vector<1x128xf32>
    %118 = vector.broadcast %117 : vector<1x128xf32> to vector<16x128xf32>
    %119 = arith.addf %115, %118 : vector<16x128xf32>
    %cst_58 = arith.constant 1.702000e+00 : f32
    %120 = vector.broadcast %cst_58 : f32 to vector<16x128xf32>
    %121 = arith.mulf %120, %119 : vector<16x128xf32>
    %122 = arith.negf %121 : vector<16x128xf32>
    %123 = math.exp %122 : vector<16x128xf32>
    %cst_59 = arith.constant 1.000000e+00 : f32
    %124 = vector.broadcast %cst_59 : f32 to vector<16x128xf32>
    %125 = arith.addf %124, %123 : vector<16x128xf32>
    %126 = arith.divf %124, %125 : vector<16x128xf32>
    %127 = arith.mulf %119, %126 : vector<16x128xf32>
    %c0_60 = arith.constant 0 : index
    %c0_61 = arith.constant 0 : index
    %c0_62 = arith.constant 0 : index
    %128 = vector.load %arg15[%c0_60, %c0_61, %c0_62] : memref<1x128x128xbf16, #tpu.memory_space<vmem>>, vector<1x128x128xbf16>
    %129 = vector.shape_cast %128 : vector<1x128x128xbf16> to vector<128x128xbf16>
    %130 = arith.extf %129 : vector<128x128xbf16> to vector<128x128xf32>
    %cst_63 = arith.constant dense<0.000000e+00> : vector<16x128xf32>
    %131 = tpu.matmul %127, %130, %cst_63 {dimension_numbers = #tpu.dot_dimension_numbers<[1], [0], [0], [1], [0, 0, 1, 1], [], []>} : vector<16x128xf32>, vector<128x128xf32>, vector<16x128xf32> -> vector<16x128xf32>
    %132 = arith.addf %85, %131 : vector<16x128xf32>
    %c0_64 = arith.constant 0 : index
    %c0_65 = arith.constant 0 : index
    %c0_66 = arith.constant 0 : index
    %133 = vector.load %arg16[%c0_64, %c0_65, %c0_66] : memref<1x1x128xf32, #tpu.memory_space<vmem>>, vector<1x1x128xf32>
    %134 = vector.shape_cast %133 : vector<1x1x128xf32> to vector<1x128xf32>
    %135 = vector.broadcast %134 : vector<1x128xf32> to vector<16x128xf32>
    %136 = arith.addf %132, %135 : vector<16x128xf32>
    %c0_67 = arith.constant 0 : index
    %c0_68 = arith.constant 0 : index
    %137 = vector.load %arg21[%c0_67, %c0_68] : memref<16x128xf32, #tpu.memory_space<vmem>>, vector<16x128xf32>
    tpu.vector_store %arg21[%c0_67, %c0_68], %136 {strides = array<i32>} : memref<16x128xf32, #tpu.memory_space<vmem>>, vector<16x128xf32>,
    %c1_i32 = arith.constant 1 : i32
    %138 = arith.cmpi eq, %arg0, %c1_i32 : i32
    %139 = arith.extui %138 : i1 to i32
    %c0_i32_69 = arith.constant 0 : i32
    %140 = arith.cmpi ne, %139, %c0_i32_69 : i32
    scf.if %140 {
      %c0_70 = arith.constant 0 : index
      %c0_71 = arith.constant 0 : index
      %141 = vector.load %arg17[%c0_70, %c0_71] : memref<1x128xf32, #tpu.memory_space<vmem>>, vector<1x128xf32>
      %c0_72 = arith.constant 0 : index
      %c0_73 = arith.constant 0 : index
      %142 = vector.load %arg18[%c0_72, %c0_73] : memref<1x128xf32, #tpu.memory_space<vmem>>, vector<1x128xf32>
      %cst_74 = arith.constant dense<0.000000e+00> : vector<16xf32>
      %143 = vector.multi_reduction <add>, %136, %cst_74 [1] : vector<16x128xf32> to vector<16xf32>
      %144 = vector.shape_cast %143 : vector<16xf32> to vector<16x1xf32>
      %cst_75 = arith.constant 3.125000e-02 : f32
      %145 = vector.broadcast %cst_75 : f32 to vector<16x1xf32>
      %146 = arith.mulf %144, %145 : vector<16x1xf32>
      %147 = vector.broadcast %146 : vector<16x1xf32> to vector<16x128xf32>
      %148 = arith.subf %136, %147 : vector<16x128xf32>
      %149 = vector.broadcast %4 : vector<1x128xf32> to vector<16x128xf32>
      %150 = arith.mulf %148, %149 : vector<16x128xf32>
      %151 = arith.mulf %150, %150 : vector<16x128xf32>
      %cst_76 = arith.constant dense<0.000000e+00> : vector<16xf32>
      %152 = vector.multi_reduction <add>, %151, %cst_76 [1] : vector<16x128xf32> to vector<16xf32>
      %153 = vector.shape_cast %152 : vector<16xf32> to vector<16x1xf32>
      %cst_77 = arith.constant 3.125000e-02 : f32
      %154 = vector.broadcast %cst_77 : f32 to vector<16x1xf32>
      %155 = arith.mulf %153, %154 : vector<16x1xf32>
      %cst_78 = arith.constant 9.99999974E-6 : f32
      %156 = vector.broadcast %cst_78 : f32 to vector<16x1xf32>
      %157 = arith.addf %155, %156 : vector<16x1xf32>
      %158 = math.rsqrt %157 : vector<16x1xf32>
      %159 = vector.broadcast %158 : vector<16x1xf32> to vector<16x128xf32>
      %160 = arith.mulf %150, %159 : vector<16x128xf32>
      %161 = vector.broadcast %141 : vector<1x128xf32> to vector<16x128xf32>
      %162 = arith.mulf %160, %161 : vector<16x128xf32>
      %163 = vector.broadcast %142 : vector<1x128xf32> to vector<16x128xf32>
      %164 = arith.addf %162, %163 : vector<16x128xf32>
      %165 = tpu.iota {dimensions = array<i32: 1>} : vector<1x16xi32>
      %c0_79 = arith.constant 0 : index
      %166 = memref.load %arg1[%c0_79] : memref<2xi32, #tpu.memory_space<smem>>
      %167 = vector.broadcast %166 : i32 to vector<1x16xi32>
      %168 = arith.cmpi eq, %165, %167 : vector<1x16xi32>
      %169 = arith.extui %168 : vector<1x16xi1> to vector<1x16xi32>
      %170 = arith.sitofp %169 : vector<1x16xi32> to vector<1x16xf32>
      %c1 = arith.constant 1 : index
      %171 = memref.load %arg1[%c1] : memref<2xi32, #tpu.memory_space<smem>>
      %172 = vector.broadcast %171 : i32 to vector<1x16xi32>
      %173 = arith.cmpi eq, %165, %172 : vector<1x16xi32>
      %174 = arith.extui %173 : vector<1x16xi1> to vector<1x16xi32>
      %175 = arith.sitofp %174 : vector<1x16xi32> to vector<1x16xf32>
      %176 = tpu.concatenate %170, %175 in 0 : vector<1x16xf32>, vector<1x16xf32> -> vector<2x16xf32>
      %cst_80 = arith.constant dense<0.000000e+00> : vector<2x128xf32>
      %177 = tpu.matmul %176, %164, %cst_80 {dimension_numbers = #tpu.dot_dimension_numbers<[1], [0], [0], [1], [0, 0, 1, 1], [], []>} : vector<2x16xf32>, vector<16x128xf32>, vector<2x128xf32> -> vector<2x128xf32>
      %c0_81 = arith.constant 0 : index
      %c0_82 = arith.constant 0 : index
      %178 = vector.load %arg19[%c0_81, %c0_82] : memref<128x128xbf16, #tpu.memory_space<vmem>>, vector<128x128xbf16>
      %179 = arith.extf %178 : vector<128x128xbf16> to vector<128x128xf32>
      %cst_83 = arith.constant dense<0.000000e+00> : vector<2x128xf32>
      %180 = tpu.matmul %177, %179, %cst_83 {dimension_numbers = #tpu.dot_dimension_numbers<[1], [0], [0], [1], [0, 0, 1, 1], [], []>} : vector<2x128xf32>, vector<128x128xf32>, vector<2x128xf32> -> vector<2x128xf32>
      %181 = arith.mulf %180, %180 : vector<2x128xf32>
      %cst_84 = arith.constant dense<0.000000e+00> : vector<2xf32>
      %182 = vector.multi_reduction <add>, %181, %cst_84 [1] : vector<2x128xf32> to vector<2xf32>
      %183 = vector.shape_cast %182 : vector<2xf32> to vector<2x1xf32>
      %184 = math.rsqrt %183 : vector<2x1xf32>
      %185 = vector.broadcast %184 : vector<2x1xf32> to vector<2x128xf32>
      %186 = arith.mulf %180, %185 : vector<2x128xf32>
      %c0_85 = arith.constant 0 : index
      %c0_86 = arith.constant 0 : index
      %187 = vector.load %arg20[%c0_85, %c0_86] : memref<2x128xf32, #tpu.memory_space<vmem>>, vector<2x128xf32>
      tpu.vector_store %arg20[%c0_85, %c0_86], %186 {strides = array<i32>} : memref<2x128xf32, #tpu.memory_space<vmem>>, vector<2x128xf32>,
    } else {
    }
    return
  }
  func.func @transform_0(%arg0: i32, %arg1: memref<2xi32, #tpu.memory_space<smem>>) -> (i32, i32) {
    %c0_i32 = arith.constant 0 : i32
    %c0_i32_0 = arith.constant 0 : i32
    %c0_i32_1 = arith.constant 0 : i32
    return %c0_i32, %c0_i32_0 : i32, i32
  }
  func.func @transform_1(%arg0: i32, %arg1: memref<2xi32, #tpu.memory_space<smem>>) -> (i32, i32) {
    %c0_i32 = arith.constant 0 : i32
    %c0_i32_0 = arith.constant 0 : i32
    %c0_i32_1 = arith.constant 0 : i32
    return %c0_i32, %c0_i32_0 : i32, i32
  }
  func.func @transform_2(%arg0: i32, %arg1: memref<2xi32, #tpu.memory_space<smem>>) -> (i32, i32) {
    %c0_i32 = arith.constant 0 : i32
    %c0_i32_0 = arith.constant 0 : i32
    %c0_i32_1 = arith.constant 0 : i32
    return %c0_i32, %c0_i32_0 : i32, i32
  }
  func.func @transform_3(%arg0: i32, %arg1: memref<2xi32, #tpu.memory_space<smem>>) -> (i32, i32, i32) {
    %c0_i32 = arith.constant 0 : i32
    %c0_i32_0 = arith.constant 0 : i32
    %c0_i32_1 = arith.constant 0 : i32
    return %arg0, %c0_i32, %c0_i32_0 : i32, i32, i32
  }
  func.func @transform_4(%arg0: i32, %arg1: memref<2xi32, #tpu.memory_space<smem>>) -> (i32, i32, i32) {
    %c0_i32 = arith.constant 0 : i32
    %c0_i32_0 = arith.constant 0 : i32
    %c0_i32_1 = arith.constant 0 : i32
    return %arg0, %c0_i32, %c0_i32_0 : i32, i32, i32
  }
  func.func @transform_5(%arg0: i32, %arg1: memref<2xi32, #tpu.memory_space<smem>>) -> (i32, i32, i32) {
    %c0_i32 = arith.constant 0 : i32
    %c0_i32_0 = arith.constant 0 : i32
    %c0_i32_1 = arith.constant 0 : i32
    return %arg0, %c0_i32, %c0_i32_0 : i32, i32, i32
  }
  func.func @transform_6(%arg0: i32, %arg1: memref<2xi32, #tpu.memory_space<smem>>) -> (i32, i32, i32) {
    %c0_i32 = arith.constant 0 : i32
    %c0_i32_0 = arith.constant 0 : i32
    %c0_i32_1 = arith.constant 0 : i32
    return %arg0, %c0_i32, %c0_i32_0 : i32, i32, i32
  }
  func.func @transform_7(%arg0: i32, %arg1: memref<2xi32, #tpu.memory_space<smem>>) -> (i32, i32, i32) {
    %c0_i32 = arith.constant 0 : i32
    %c0_i32_0 = arith.constant 0 : i32
    %c0_i32_1 = arith.constant 0 : i32
    return %arg0, %c0_i32, %c0_i32_0 : i32, i32, i32
  }
  func.func @transform_8(%arg0: i32, %arg1: memref<2xi32, #tpu.memory_space<smem>>) -> (i32, i32, i32) {
    %c0_i32 = arith.constant 0 : i32
    %c0_i32_0 = arith.constant 0 : i32
    %c0_i32_1 = arith.constant 0 : i32
    return %arg0, %c0_i32, %c0_i32_0 : i32, i32, i32
  }
  func.func @transform_9(%arg0: i32, %arg1: memref<2xi32, #tpu.memory_space<smem>>) -> (i32, i32, i32) {
    %c0_i32 = arith.constant 0 : i32
    %c0_i32_0 = arith.constant 0 : i32
    %c0_i32_1 = arith.constant 0 : i32
    return %arg0, %c0_i32, %c0_i32_0 : i32, i32, i32
  }
  func.func @transform_10(%arg0: i32, %arg1: memref<2xi32, #tpu.memory_space<smem>>) -> (i32, i32, i32) {
    %c0_i32 = arith.constant 0 : i32
    %c0_i32_0 = arith.constant 0 : i32
    %c0_i32_1 = arith.constant 0 : i32
    return %arg0, %c0_i32, %c0_i32_0 : i32, i32, i32
  }
  func.func @transform_11(%arg0: i32, %arg1: memref<2xi32, #tpu.memory_space<smem>>) -> (i32, i32, i32) {
    %c0_i32 = arith.constant 0 : i32
    %c0_i32_0 = arith.constant 0 : i32
    %c0_i32_1 = arith.constant 0 : i32
    return %arg0, %c0_i32, %c0_i32_0 : i32, i32, i32
  }
  func.func @transform_12(%arg0: i32, %arg1: memref<2xi32, #tpu.memory_space<smem>>) -> (i32, i32, i32) {
    %c0_i32 = arith.constant 0 : i32
    %c0_i32_0 = arith.constant 0 : i32
    %c0_i32_1 = arith.constant 0 : i32
    return %arg0, %c0_i32, %c0_i32_0 : i32, i32, i32
  }
  func.func @transform_13(%arg0: i32, %arg1: memref<2xi32, #tpu.memory_space<smem>>) -> (i32, i32, i32) {
    %c0_i32 = arith.constant 0 : i32
    %c0_i32_0 = arith.constant 0 : i32
    %c0_i32_1 = arith.constant 0 : i32
    return %arg0, %c0_i32, %c0_i32_0 : i32, i32, i32
  }
  func.func @transform_14(%arg0: i32, %arg1: memref<2xi32, #tpu.memory_space<smem>>) -> (i32, i32, i32) {
    %c0_i32 = arith.constant 0 : i32
    %c0_i32_0 = arith.constant 0 : i32
    %c0_i32_1 = arith.constant 0 : i32
    return %arg0, %c0_i32, %c0_i32_0 : i32, i32, i32
  }
  func.func @transform_15(%arg0: i32, %arg1: memref<2xi32, #tpu.memory_space<smem>>) -> (i32, i32) {
    %c0_i32 = arith.constant 0 : i32
    %c0_i32_0 = arith.constant 0 : i32
    %c0_i32_1 = arith.constant 0 : i32
    return %c0_i32, %c0_i32_0 : i32, i32
  }
  func.func @transform_16(%arg0: i32, %arg1: memref<2xi32, #tpu.memory_space<smem>>) -> (i32, i32) {
    %c0_i32 = arith.constant 0 : i32
    %c0_i32_0 = arith.constant 0 : i32
    %c0_i32_1 = arith.constant 0 : i32
    return %c0_i32, %c0_i32_0 : i32, i32
  }
  func.func @transform_17(%arg0: i32, %arg1: memref<2xi32, #tpu.memory_space<smem>>) -> (i32, i32) {
    %c0_i32 = arith.constant 0 : i32
    %c0_i32_0 = arith.constant 0 : i32
    %c0_i32_1 = arith.constant 0 : i32
    return %c0_i32, %c0_i32_0 : i32, i32
  }
  func.func @transform_18(%arg0: i32, %arg1: memref<2xi32, #tpu.memory_space<smem>>) -> (i32, i32) {
    %c0_i32 = arith.constant 0 : i32
    %c0_i32_0 = arith.constant 0 : i32
    %c0_i32_1 = arith.constant 0 : i32
    return %c0_i32, %c0_i32_0 : i32, i32
  }
}

</mosaic_0001>

<bundles_post_ra>
// kernel: clip_encode_text.1
= control target key start
LH: loop header
LB: loop body
LE: loop exit
PB: predicated region body
PF: predicated region fallthrough
CT: control target
= control target key end

     0   :  { %s3925_s0 = inlined_call_operand.vmem [shape: s32[2], index: 0, kind: input, shape index: {}]   ;;  %s3926_s1 = inlined_call_operand.vmem [shape: f32[16,128], index: 1, kind: input, shape index: {}]   ;;  %s3927_s2 = inlined_call_operand.vmem [shape: f32[64,16], index: 2, kind: input, shape index: {}]   ;;  %s3928_s3 = inlined_call_operand.vmem [shape: f32[1,128], index: 3, kind: input, shape index: {}]   ;;  %s3929_s4 = inlined_call_operand.vmem [shape: f32[2,1,128], index: 4, kind: input, shape index: {}]   ;;  %s3930_s5 = inlined_call_operand.vmem [shape: f32[2,1,128], index: 5, kind: input, shape index: {}]   ;;  %s3931_s6 = inlined_call_operand.vmem [shape: bf16[2,128,96], index: 6, kind: input, shape index: {}]   ;;  %s3932_s7 = inlined_call_operand.vmem [shape: f32[2,1,96], index: 7, kind: input, shape index: {}]   ;;  %s3933_s8 = inlined_call_operand.vmem [shape: bf16[2,32,128], index: 8, kind: input, shape index: {}]   ;;  %s3934_s9 = inlined_call_operand.vmem [shape: f32[2,1,128], index: 9, kind: input, shape index: {}]   ;;  %s3935_s10 = inlined_call_operand.vmem [shape: f32[2,1,128], index: 10, kind: input, shape index: {}]   ;;  %s3936_s11 = inlined_call_operand.vmem [shape: f32[2,1,128], index: 11, kind: input, shape index: {}]   ;;  %s3937_s12 = inlined_call_operand.vmem [shape: bf16[2,128,128], index: 12, kind: input, shape index: {}]   ;;  %s3938_s13 = inlined_call_operand.vmem [shape: f32[2,1,128], index: 13, kind: input, shape index: {}]   ;;  %s3939_s14 = inlined_call_operand.vmem [shape: bf16[2,128,128], index: 14, kind: input, shape index: {}]   ;;  %s3940_s15 = inlined_call_operand.vmem [shape: f32[2,1,128], index: 15, kind: input, shape index: {}]   ;;  %s3941_s16 = inlined_call_operand.vmem [shape: f32[1,128], index: 16, kind: input, shape index: {}]   ;;  %s3942_s17 = inlined_call_operand.vmem [shape: f32[1,128], index: 17, kind: input, shape index: {}]   ;;  %s3943_s18 = inlined_call_operand.vmem [shape: bf16[128,128], index: 18, kind: input, shape index: {}]   ;;  %s3944_s19 = inlined_call_operand.hbm [shape: f32[2,128], index: 19, kind: output, shape index: {}]  }
   0x1   :  { %3950 = sst [smem:[#allocation10_spill]] %s3925_s0 }
   0x2   :  { %3951 = sst [smem:[#allocation11_spill]] %s3926_s1  ;;  %s3961_s20 = sld [smem:[#allocation10_spill]] }
   0x3   :  { %3952 = sst [smem:[#allocation12_spill]] %s3927_s2 }
   0x4   :  { %3953 = sst [smem:[#allocation13_spill]] %s3928_s3 }
   0x5   :  { %3954 = sst [smem:[#allocation14_spill]] %s3931_s6 }
   0x6   :  { %3955 = sst [smem:[#allocation15_spill]] %s3933_s8 }
   0x7   :  { %3956 = sst [smem:[#allocation16_spill]] %s3938_s13 }
   0x8   :  { %3957 = sst [smem:[#allocation17_spill]] %s3941_s16  ;;  %s24_s13 = sshll.u32 %s3961_s20, 4  ;;  %s25_s13 = int_to_ptr.vmem [resolvable:$true] %s24_s13 }
   0x9   :  { %3958 = sst [smem:[#allocation18_spill]] %s3942_s17  ;;  %s3405_s21 = scalar_lea.vmem %s25_s13, 16 }
   0xa   :  { %3959 = sst [smem:[#allocation19_spill]] %s3943_s18  ;;  %p3406_p0 = scmp.ne.s32.totalorder %s25_s13, %s3405_s21 }
   0xb   :  { %3960 = sst [smem:[#allocation20_spill]] %s3944_s19  ;;  %p3410_p1 = scmp.lt.s32.totalorder %s25_s13, %s25_s13 }
   0xc   :  { %p3411_p2 = scmp.lt.s32.totalorder %s3405_s21, %s3405_s21 }
   0xe   :  { %p3412_p3 = por %p3411_p2, %p3410_p1 }
  0x10   :  { %p3413_p4 = pnand %p3412_p3, %p3406_p0 }
  0x12   :  { %3416 = shalt.err (!%p3413_p4)  }
  0x13   :  { %s3457_s1 = smov [#allocation4]  }
  0x14   :  { %27 = dma.vmem_to_smem %s25_s13, 16, %s3457_s1, [#allocation3] }
  0x15   :  { %3447 = dma.done.wait [#allocation3], 16 }
  0x16   :  { %3448 = vsyncadd [#allocation3], 4294967280 }
  0x17   :  { %29 = sfence }
  0x18   :  { %30 = vsyncpa [#allocation6], 0  ;;  %s3579_s22 = smov 0  }
  0x19 LB: > { %3962 = sst [smem:[#allocation9_spill]] %s3455_s22  ;;  %s3585_s2 = sadd.s32 4294967295, %s3455_s22   ;;  %s3455_s22 = sphi %s3579_s22, %s36_s22  }
  0x1a   : > { %p2554_p5 = scmp.ge.s32.totalorder %s3455_s22, 1  ;;  %p609_p6 = scmp.lt.s32.totalorder %s3455_s22, 3 }
  0x1c   : > { %p610_p7 = pnand %p2554_p5, %p609_p6 }
  0x1d   : > { %p697_p8 = scmp.lt.s32.totalorder (!%p610_p7), %s3585_s2, 1  ;;  %s3963_s6 = sld [smem:[#allocation14_spill]] (!%p610_p7) }
  0x1e   : > { %613 = sbr.rel (%p610_p7) target bundleno = 3541 (0xdd5), region = 92  ;;  %s3964_s8 = sld [smem:[#allocation15_spill]] (!%p610_p7) }
  0x1f   : > { %s3965_s24 = sld [smem:[#allocation16_spill]] (!%p610_p7)  ;;  %p2563_p9 = scmp.ne.s32.totalorder (!%p610_p7), %s3585_s2, 0 }
  0x25   : > { %s3591_s13 = scalar_select %p697_p8, %s3585_s2, 1 }
  0x26   : > { %744 = sbr.rel (%p2563_p9) target bundleno = 46 (0x2e), region = 96  ;;  %s3966_s0 = sld [smem:[#allocation11_spill]] (!%p2563_p9) }
  0x27   : > { %s2612_s28 = sshll.u32 %s3591_s13, 6  ;;  %s2613_s23 = sshll.u32 %s3591_s13, 4 }
  0x28   : > { %s3609_s1 = scalar_lea.vmem %s3963_s6, %s2612_s28  ;;  %s3615_s19 = scalar_lea.vmem %s3964_s8, %s2613_s23 }
  0x29   : > { %s718_s3 = scalar_lea.vmem %s3934_s9, %s3591_s13  ;;  %s3632_s16 = scalar_lea.vmem %s3937_s12, %s2612_s28 }
  0x2a   : > { %s732_s8 = scalar_lea.vmem %s3965_s24, %s3591_s13  ;;  %s3641_s25 = scalar_lea.vmem %s3939_s14, %s2612_s28 }
  0x2b   : > { %s740_s29 = scalar_lea.vmem %s3940_s15, %s3591_s13 }
  0x2c   : > { %v745_v0 = vld [vmem:[%s3966_s0] sm:$0xff] (!%p2563_p9)  ;;  %v746_v1 = vld [vmem:[%s3966_s0 + $0x8] sm:$0xff] (!%p2563_p9) }
  0x2d   : > { %747 = vst [vmem:[#allocation2] sm:$0xff] %v745_v0  ;;  %748 = vst [vmem:[#allocation2 + $0x8] sm:$0xff] %v746_v1 }
  0x2e PF: > { %v2617_v4 = vld [vmem:[%s3609_s1] sm:$0xff]   ;;  %v2752_v5 = vld [vmem:[%s3609_s1 + $0x8] sm:$0xff]   ;;  %s3967_s20 = sld [smem:[#allocation13_spill]]  ;;  %v2753_v17 = vld [vmem:[%s3609_s1 + $0x10] sm:$0xff]   ;;  %s3968_s24 = scalar_lea.vmem %s3929_s4, %s3591_s13  ;;  %vm920_vm0 = vcmask 64512   ;;  %vm1293_vm2 = vcmask 130048  }
  0x2f   : > { %3108 = vmatprep.subr.bf16.mxu0 %v2617_v4  ;;  %v2754_v18 = vld [vmem:[%s3609_s1 + $0x18] sm:$0xff]   ;;  %v2755_v19 = vld [vmem:[%s3609_s1 + $0x20] sm:$0xff]   ;;  %v2756_v20 = vld [vmem:[%s3609_s1 + $0x28] sm:$0xff]   ;;  %s3969_s27 = scalar_lea.vmem %s3930_s5, %s3591_s13  ;;  %s3970_s6 = scalar_lea.vmem %s3932_s7, %s3591_s13  ;;  %vm1758_vm3 = vcmask 195584   ;;  %vm1769_vm4 = vcmask 261120  }
  0x30   : > { %3110 = vmatpush3.bf16.msra.mxu0 %v2617_v4  ;;  %v2757_v21 = vld [vmem:[%s3609_s1 + $0x30] sm:$0xff]   ;;  %v2758_v22 = vld [vmem:[%s3609_s1 + $0x38] sm:$0xff]   ;;  %v2565_v30 = vld [vmem:[%s3968_s24] ss:$0 sm:$0xff]  ;;  %s3458_s21 = smov 88   ;;  %s3459_s18 = smov 96  }
  0x31   : > { %3112 = vmatprep.subr.bf16.mxu0 %v2752_v5  ;;  %v2566_v32 = vld [vmem:[%s3969_s27] ss:$0 sm:$0xff]  ;;  %s3460_s28 = smov 80   ;;  %s3462_s22 = smov 112   ;;  %vm3701_vm1 = vmpackc.low %vm920_vm0, %vm920_vm0 }
  0x32   : > { %v2567_v39 = vld [vmem:[%s3970_s6] ss:$0 sm:$0xff]  ;;  %s3463_s23 = smov 72   ;;  %s3464_s24 = smov 104  }
  0x33   : > { %s3973_s27 = sld [smem:[#allocation12_spill]]  ;;  %s3465_s6 = smov 56  }
  0x34   : > { %v3654_v2 = vld [vmem:[#allocation2] sm:$0xff]  ;;  %v3657_v3 = vld [vmem:[#allocation2 + $0x8] sm:$0xff]  ;;  %3114 = vmatpush3.bf16.msra.mxu0 %v2752_v5  ;;  %s3974_s17 = scalar_lea.vmem %s3935_s10, %s3591_s13  ;;  %s3975_s30 = scalar_lea.vmem %s3936_s11, %s3591_s13 }
  0x35   : > { %754 = vadd.xlane.f32.xlu0 %v3654_v2  ;;  %v3665_v8 = vld [vmem:[%s3967_s20] ss:$0 sm:$0xff]  ;;  %3116 = vmatprep.subr.bf16.mxu0 %v2753_v17  ;;  %s3461_s20 = smov 120   ;;  %p2601_p10 = scmp.ne.s32.totalorder %s3585_s2, 1 }
  0x36   : > { %vm3473_vm5 = vmmov (!%p2601_p10), 0   ;;  %vm2212_vm8 = vcmask (!%p2601_p10), 1040384   ;;  %vm2390_vm9 = vcmask (!%p2601_p10), 1041408  }
  0x38   : > { %3118 = vmatpush3.bf16.msra.mxu0 %v2753_v17 }
  0x39   : > { %756 = vadd.xlane.f32.xlu0 %v3657_v3  ;;  %3120 = vmatprep.subr.bf16.mxu0 %v2754_v18  ;;  %v1279_v17 = vld [vmem:[%s3973_s27 + $0x10] sm:$0xff] }
  0x3c   : > { %3122 = vmatpush3.bf16.msra.mxu0 %v2754_v18 }
  0x3d   : > { %3124 = vmatprep.subr.bf16.mxu0 %v2755_v19 }
  0x40   : > { %3126 = vmatpush3.bf16.msra.mxu0 %v2755_v19 }
  0x41   : > { %3128 = vmatprep.subr.bf16.mxu0 %v2756_v20 }
  0x44   : > { %3130 = vmatpush3.bf16.msra.mxu0 %v2756_v20 }
  0x45   : > { %3132 = vmatprep.subr.bf16.mxu0 %v2757_v21 }
  0x48   : > { %3134 = vmatpush3.bf16.msra.mxu0 %v2757_v21 }
  0x49   : > { %3136 = vmatprep.subr.bf16.mxu0 %v2758_v22 }
  0x4c   : > { %3138 = vmatpush3.bf16.msra.mxu0 %v2758_v22  ;;  %v1282_v22 = vld [vmem:[%s3973_s27 + $0x28] sm:$0xff] }
  0xc2   : > { %v755_v6 = vpop.xlane.xlu0 %754 }
  0xc3   : > { %v758_v7 = vmul.f32 0.03125, %v755_v6  ;;  %v1278_v6 = vld [vmem:[%s3973_s27 + $0x8] sm:$0xff] }
  0xc5   : > { %v760_v9 = vsub.f32 %v3654_v2, %v758_v7  ;;  %v1277_v7 = vld [vmem:[%s3973_s27] sm:$0xff] }
  0xc6   : > { %v757_v10 = vpop.xlane.xlu0 %756 }
  0xc7   : > { %v759_v11 = vmul.f32 0.03125, %v757_v10  ;;  %v768_v12 = vmul.f32 %v3665_v8, %v760_v9 }
  0xc9   : > { %v761_v13 = vsub.f32 %v3657_v3, %v759_v11  ;;  %v770_v14 = vmul.f32 %v768_v12, %v768_v12 }
  0xcb   : > { %772 = vadd.xlane.f32.xlu1 %v770_v14  ;;  %v769_v15 = vmul.f32 %v3665_v8, %v761_v13 }
  0xcd   : > { %v771_v16 = vmul.f32 %v769_v15, %v769_v15 }
  0xcf   : > { %774 = vadd.xlane.f32.xlu1 %v771_v16 }
 0x158   : > { %v773_v23 = vpop.xlane.xlu1 %772 }
 0x159   : > { %v776_v24 = vmul.f32 0.03125, %v773_v23 }
 0x15b   : > { %v778_v25 = vadd.f32 1e-05, %v776_v24  ;;  %v1281_v24 = vld [vmem:[%s3973_s27 + $0x20] sm:$0xff] }
 0x15c   : > { %v775_v26 = vpop.xlane.xlu1 %774 }
 0x15d   : > { %3351 = vrsqrt.f32 %v778_v25  ;;  %v777_v27 = vmul.f32 0.03125, %v775_v26 }
 0x15f   : > { %v779_v28 = vadd.f32 1e-05, %v777_v27 }
 0x161   : > { %3353 = vrsqrt.f32 %v779_v28 }
 0x167   : > { %v3352_v29 = vpop.eup %3351 }
 0x168   : > { %v782_v31 = vmul.f32 %v3352_v29, %v768_v12 }
 0x16a   : > { %v790_v33 = vmul.f32 %v2565_v30, %v782_v31  ;;  %v1284_v31 = vld [vmem:[%s3973_s27 + $0x38] sm:$0xff] }
 0x16b   : > { %v3354_v34 = vpop.eup %3353 }
 0x16c   : > { %v783_v35 = vmul.f32 %v3354_v34, %v769_v15  ;;  %v798_v36 = vadd.f32 %v2566_v32, %v790_v33  ;;  %v1280_v15 = vld [vmem:[%s3973_s27 + $0x18] sm:$0xff] }
 0x16e   : > { %v791_v37 = vmul.f32 %v2565_v30, %v783_v35  ;;  %2925 = vmatprep.mubr.f32.mxu0 %v798_v36 }
 0x170   : > { %v799_v38 = vadd.f32 %v2566_v32, %v791_v37  ;;  %v1283_v32 = vld [vmem:[%s3973_s27 + $0x30] sm:$0xff] }
 0x172   : > { %2926 = vmatmul.mubr.f32.vlgmr.msra.gmra.mrb[0].mxu0 %v799_v38 }
 0x245   : > { %v2927_v40 = vpop.f32.mrb[0].mxu0 }
 0x246   : > { %v911_v41 = vadd.f32 %v2927_v40, %v2567_v39  ;;  %v905_v42 = vpop.f32.mrb[1].mxu0 }
 0x247   : > { %v906_v43 = vadd.f32 %v2567_v39, %v905_v42 }
 0x249   : > { %2932 = vmatprep.mubr.msk.f32.mxu1 %vm920_vm0, %v906_v43  ;;  %v3693_v44 = vpack.i.bf16 %v911_v41, %v906_v43 }
 0x24b   : > { %3317 = vrot.lane.b32.xlu1 %v3693_v44, %s3458_s21  ;;  %3312 = vrot.lane.b32.xlu0 %v3693_v44, %s3459_s18  ;;  %s3466_s21 = smov 48   ;;  %s3467_s18 = smov 64  }
 0x24f   : > { %3322 = vrot.lane.b32.xlu1 %v3693_v44, %s3460_s28  ;;  %1006 = vrot.lane.b32.xlu0 %v911_v41, %s3461_s20  ;;  %s3468_s28 = smov 40  }
 0x253   : > { %1004 = vrot.lane.b32.xlu1 %v906_v43, %s3461_s20  ;;  %1095 = vrot.lane.b32.xlu0 %v906_v43, %s3462_s22  ;;  %s3469_s20 = smov 8  }
 0x257   : > { %3327 = vrot.lane.b32.xlu1 %v3693_v44, %s3463_s23  ;;  %1186 = vrot.lane.b32.xlu0 %v906_v43, %s3464_s24  ;;  %s3471_s23 = smov 24  }
 0x25b   : > { %1097 = vrot.lane.b32.xlu1 %v911_v41, %s3462_s22  ;;  %s3470_s22 = smov 16  }
 0x25f   : > { %1188 = vrot.lane.b32.xlu1 %v911_v41, %s3464_s24 }
 0x2bd   : > { %v3318_v45 = vpop.permute.xlu1 %3317  ;;  %v3313_v46 = vpop.permute.xlu0 %3312 }
 0x2be   : > { %v3320_v47 = vunpack.i.h.bf16 %v3318_v45  ;;  %v3319_v48 = vunpack.i.l.bf16 %v3318_v45  ;;  %v3315_v49 = vunpack.i.h.bf16 %v3313_v46  ;;  %v3314_v50 = vunpack.i.l.bf16 %v3313_v46 }
 0x2c0   : > { %v3139_v52 = vpack.c.bf16 %v3315_v49, %v3314_v50  ;;  %v3145_v54 = vpack.c.bf16 %v3320_v47, %v3319_v48 }
 0x2c1   : > { %v3323_v53 = vpop.permute.xlu1 %3322  ;;  %v1007_v60 = vpop.permute.xlu0 %1006 }
 0x2c2   : > { %3141 = vmatprep.subr.msk.bf16.mxu1 %vm3701_vm1, %v3139_v52  ;;  %v3325_v56 = vunpack.i.h.bf16 %v3323_v53  ;;  %v3324_v57 = vunpack.i.l.bf16 %v3323_v53 }
 0x2c3   : > { %3144 = vmatpush3.bf16.xpose.msk.msra.mxu1 %vm3701_vm1, %v3139_v52 }
 0x2c4   : > { %3147 = vmatprep.subr.msk.bf16.mxu1 %vm3701_vm1, %v3145_v54  ;;  %v3151_v58 = vpack.c.bf16 %v3325_v56, %v3324_v57 }
 0x2c5   : > { %v1005_v55 = vpop.permute.xlu1 %1004  ;;  %v1096_v63 = vpop.permute.xlu0 %1095 }
 0x2c9   : > { %v3328_v59 = vpop.permute.xlu1 %3327  ;;  %v1187_v4 = vpop.permute.xlu0 %1186 }
 0x2ca   : > { %2933 = vmatmul.mubr.msk.f32.vlgmr.msra.gmra.mrb[0].mxu1 %vm920_vm0, %v911_v41  ;;  %v3330_v61 = vunpack.i.h.bf16 %v3328_v59  ;;  %v3329_v62 = vunpack.i.l.bf16 %v3328_v59 }
 0x2cb   : > { %3150 = vmatpush3.bf16.xpose.msk.msra.mxu1 %vm3701_vm1, %v3145_v54  ;;  %2939 = vmatprep.mubr.msk.f32.mxu1 %vm920_vm0, %v1005_v55 }
 0x2cc   : > { %3153 = vmatprep.subr.msk.bf16.mxu1 %vm3701_vm1, %v3151_v58  ;;  %v3157_v0 = vpack.c.bf16 %v3330_v61, %v3329_v62 }
 0x2cd   : > { %v1098_v1 = vpop.permute.xlu1 %1097 }
 0x2d1   : > { %v1189_v5 = vpop.permute.xlu1 %1188 }
 0x2d2   : > { %2940 = vmatmul.mubr.msk.f32.vlgmr.msra.gmra.mrb[2].mxu1 %vm920_vm0, %v1007_v60 }
 0x2d3   : > { %3156 = vmatpush3.bf16.xpose.msk.msra.mxu1 %vm3701_vm1, %v3151_v58  ;;  %2946 = vmatprep.mubr.msk.f32.mxu1 %vm920_vm0, %v1096_v63 }
 0x2d4   : > { %3159 = vmatprep.subr.msk.bf16.mxu1 %vm3701_vm1, %v3157_v0 }
 0x2da   : > { %2947 = vmatmul.mubr.msk.f32.vlgmr.msra.gmra.mrb[4].mxu1 %vm920_vm0, %v1098_v1 }
 0x2db   : > { %3162 = vmatpush3.bf16.xpose.msk.msra.mxu1 %vm3701_vm1, %v3157_v0  ;;  %2953 = vmatprep.mubr.msk.f32.mxu1 %vm920_vm0, %v1187_v4 }
 0x2e2   : > { %2954 = vmatmul.mubr.msk.f32.vlgmr.msra.gmra.mrb[6].mxu1 %vm920_vm0, %v1189_v5 }
 0x39d   : > { %v2934_v9 = vpop.f32.mrb[0].mxu1 }
 0x39e   : > { %v1286_v10 = vadd.f32 %v2934_v9, %v1278_v6  ;;  %v995_v11 = vpop.f32.mrb[1].mxu1 }
 0x39f   : > { %v1285_v12 = vadd.f32 %v1277_v7, %v995_v11 }
 0x3a0   : > { %v1297_v13 = vsel %vm1293_vm2, %v1286_v10, -inf }
 0x3a1   : > { %1298 = vmax.xlane.f32.xlu1 %v1297_v13  ;;  %v1294_v14 = vsel %vm1293_vm2, %v1285_v12, -inf }
 0x3a2   : > { %1295 = vmax.xlane.f32.xlu0 %v1294_v14 }
 0x3a5   : > { %v2941_v16 = vpop.f32.mrb[2].mxu1 }
 0x3a6   : > { %v1288_v18 = vadd.f32 %v2941_v16, %v1280_v15  ;;  %v1086_v19 = vpop.f32.mrb[3].mxu1 }
 0x3a7   : > { %v1287_v20 = vadd.f32 %v1279_v17, %v1086_v19 }
 0x3a8   : > { %v1303_v21 = vsel %vm1293_vm2, %v1288_v18, -inf }
 0x3a9   : > { %1304 = vmax.xlane.f32.xlu0 %v1303_v21  ;;  %v1300_v23 = vsel %vm1293_vm2, %v1287_v20, -inf }
 0x3ad   : > { %1301 = vmax.xlane.f32.xlu0 %v1300_v23  ;;  %v2948_v25 = vpop.f32.mrb[4].mxu1 }
 0x3ae   : > { %v1290_v26 = vadd.f32 %v2948_v25, %v1282_v22  ;;  %v1177_v27 = vpop.f32.mrb[5].mxu1 }
 0x3af   : > { %v1289_v28 = vadd.f32 %v1281_v24, %v1177_v27 }
 0x3b0   : > { %v1309_v29 = vsel %vm1293_vm2, %v1290_v26, -inf }
 0x3b1   : > { %1310 = vmax.xlane.f32.xlu1 %v1309_v29  ;;  %v1306_v30 = vsel %vm1293_vm2, %v1289_v28, -inf }
 0x3b2   : > { %1307 = vmax.xlane.f32.xlu0 %v1306_v30 }
 0x3b5   : > { %v2955_v33 = vpop.f32.mrb[6].mxu1 }
 0x3b6   : > { %v1292_v34 = vadd.f32 %v2955_v33, %v1284_v31  ;;  %v1268_v35 = vpop.f32.mrb[7].mxu1 }
 0x3b7   : > { %v1291_v36 = vadd.f32 %v1283_v32, %v1268_v35 }
 0x3b8   : > { %v1315_v37 = vsel %vm1293_vm2, %v1292_v34, -inf }
 0x3b9   : > { %1316 = vmax.xlane.f32.xlu1 %v1315_v37  ;;  %v1312_v38 = vsel %vm1293_vm2, %v1291_v36, -inf }
 0x3ba   : > { %1313 = vmax.xlane.f32.xlu0 %v1312_v38 }
 0x42e   : > { %v1299_v39 = vpop.xlane.xlu1 %1298 }
 0x42f   : > { %v1319_v40 = vsub.f32 %v1286_v10, %v1299_v39  ;;  %v1296_v41 = vpop.xlane.xlu0 %1295 }
 0x430   : > { %v1318_v42 = vsub.f32 %v1285_v12, %v1296_v41 }
 0x431   : > { %v1328_v43 = vmul.f32 1.442695, %v1319_v40 }
 0x432   : > { %v1326_v45 = vmul.f32 1.442695, %v1318_v42 }
 0x433   : > { %3355 = vpow2.f32 %v1328_v43 }
 0x434   : > { %3357 = vpow2.f32 %v1326_v45 }
 0x436   : > { %v1305_v46 = vpop.xlane.xlu0 %1304 }
 0x437   : > { %v1321_v47 = vsub.f32 %v1288_v18, %v1305_v46 }
 0x439   : > { %v1332_v48 = vmul.f32 1.442695, %v1321_v47 }
 0x43a   : > { %v1302_v49 = vpop.xlane.xlu0 %1301 }
 0x43b   : > { %3359 = vpow2.f32 %v1332_v48  ;;  %v1320_v50 = vsub.f32 %v1287_v20, %v1302_v49 }
 0x43d   : > { %v3760_v51 = vpop.eup %3355  ;;  %v1330_v52 = vmul.f32 1.442695, %v1320_v50 }
 0x43e   : > { %v3358_v53 = vpop.eup %3357  ;;  %v1311_v54 = vpop.xlane.xlu1 %1310  ;;  %v1345_v55 = vsel %vm1293_vm2, %v3760_v51, 0.0 }
 0x43f   : > { %3361 = vpow2.f32 %v1330_v52  ;;  %v1323_v56 = vsub.f32 %v1290_v26, %v1311_v54  ;;  %v1308_v57 = vpop.xlane.xlu0 %1307  ;;  %1346 = vadd.xlane.f32.xlu1 %v1345_v55  ;;  %v1342_v58 = vsel %vm1293_vm2, %v3358_v53, 0.0 }
 0x440   : > { %v1322_v59 = vsub.f32 %v1289_v28, %v1308_v57  ;;  %1343 = vadd.xlane.f32.xlu0 %v1342_v58 }
 0x441   : > { %v1336_v60 = vmul.f32 1.442695, %v1323_v56 }
 0x442   : > { %v1334_v61 = vmul.f32 1.442695, %v1322_v59  ;;  %v2649_v59 = vld [vmem:[%s3615_s19] sm:$0xff]  }
 0x443   : > { %3363 = vpow2.f32 %v1336_v60  ;;  %v2759_v60 = vld [vmem:[%s3615_s19 + $0x8] sm:$0xff]   ;;  %s3979_s19 = sld [smem:[#allocation18_spill]] (!%p2601_p10) }
 0x444   : > { %3365 = vpow2.f32 %v1334_v61 }
 0x445   : > { %v3765_v62 = vpop.eup %3359 }
 0x446   : > { %v1317_v63 = vpop.xlane.xlu1 %1316  ;;  %v1351_v0 = vsel %vm1293_vm2, %v3765_v62, 0.0 }
 0x447   : > { %v1325_v1 = vsub.f32 %v1292_v34, %v1317_v63  ;;  %1352 = vadd.xlane.f32.xlu1 %v1351_v0  ;;  %v1314_v4 = vpop.xlane.xlu0 %1313 }
 0x448   : > { %v1324_v5 = vsub.f32 %v1291_v36, %v1314_v4 }
 0x449   : > { %v3769_v6 = vpop.eup %3361  ;;  %v1340_v7 = vmul.f32 1.442695, %v1325_v1 }
 0x44a   : > { %v1338_v9 = vmul.f32 1.442695, %v1324_v5  ;;  %v1348_v10 = vsel %vm1293_vm2, %v3769_v6, 0.0 }
 0x44b   : > { %3367 = vpow2.f32 %v1340_v7  ;;  %1349 = vadd.xlane.f32.xlu0 %v1348_v10 }
 0x44c   : > { %3369 = vpow2.f32 %v1338_v9 }
 0x44d   : > { %v3773_v11 = vpop.eup %3363 }
 0x44e   : > { %v3366_v12 = vpop.eup %3365  ;;  %v1357_v13 = vsel %vm1293_vm2, %v3773_v11, 0.0 }
 0x44f   : > { %1358 = vadd.xlane.f32.xlu1 %v1357_v13  ;;  %v1354_v14 = vsel %vm1293_vm2, %v3366_v12, 0.0 }
 0x450   : > { %1355 = vadd.xlane.f32.xlu0 %v1354_v14 }
 0x455   : > { %v3778_v15 = vpop.eup %3367 }
 0x456   : > { %v3780_v16 = vpop.eup %3369  ;;  %v1363_v17 = vsel %vm1293_vm2, %v3778_v15, 0.0 }
 0x457   : > { %1364 = vadd.xlane.f32.xlu1 %v1363_v17  ;;  %v1360_v18 = vsel %vm1293_vm2, %v3780_v16, 0.0 }
 0x458   : > { %1361 = vadd.xlane.f32.xlu0 %v1360_v18 }
 0x468   : > { %3337 = vrot.lane.b32.xlu1 %v3693_v44, %s3465_s6 }
 0x46c   : > { %3342 = vrot.lane.b32.xlu1 %v3693_v44, %s3466_s21 }
 0x46e   : > { %3332 = vrot.lane.b32.xlu0 %v3693_v44, %s3467_s18 }
 0x470   : > { %3347 = vrot.lane.b32.xlu1 %v3693_v44, %s3468_s28  ;;  %s3977_s28 = sld [smem:[#allocation19_spill]] (!%p2601_p10) }
 0x4cc   : > { %v1347_v21 = vpop.xlane.xlu1 %1346 }
 0x4cd   : > { %v1344_v19 = vpop.xlane.xlu0 %1343 }
 0x4ce   : > { %3371 = vrcp.f32 %v1344_v19 }
 0x4d4   : > { %v1353_v24 = vpop.xlane.xlu1 %1352 }
 0x4d8   : > { %v3372_v20 = vpop.eup %3371  ;;  %v1350_v22 = vpop.xlane.xlu0 %1349 }
 0x4d9   : > { %v1374_v23 = vmul.f32 %v3372_v20, %v3358_v53 }
 0x4db   : > { %2960 = vmatprep.mubr.msk.f32.mxu1 %vm1293_vm2, %v1374_v23 }
 0x4dc   : > { %v1359_v26 = vpop.xlane.xlu1 %1358 }
 0x4dd   : > { %v1356_v25 = vpop.xlane.xlu0 %1355 }
 0x4de   : > { %3373 = vrcp.f32 %v1356_v25 }
 0x4df   : > { %3375 = vrcp.f32 %v1347_v21  ;;  %v2594_v21 = vld [vmem:[%s718_s3] ss:$0 sm:$0xff] }
 0x4e0   : > { %3377 = vrcp.f32 %v1350_v22 }
 0x4e1   : > { %3379 = vrcp.f32 %v1359_v26 }
 0x4e2   : > { %3381 = vrcp.f32 %v1353_v24 }
 0x4e4   : > { %v1365_v27 = vpop.xlane.xlu1 %1364 }
 0x4e5   : > { %v1362_v28 = vpop.xlane.xlu0 %1361 }
 0x4e6   : > { %3383 = vrcp.f32 %v1362_v28  ;;  %v2760_v28 = vld [vmem:[%s3632_s16 + $0x8] sm:$0xff]  }
 0x4e7   : > { %3385 = vrcp.f32 %v1365_v27  ;;  %v2657_v27 = vld [vmem:[%s3632_s16] sm:$0xff]  }
 0x4e8   : > { %v3374_v29 = vpop.eup %3373  ;;  %v3338_v44 = vpop.permute.xlu1 %3337 }
 0x4e9   : > { %v3333_v30 = vpop.permute.xlu0 %3332  ;;  %v1378_v31 = vmul.f32 %v3374_v29, %v3366_v12  ;;  %v3340_v32 = vunpack.i.h.bf16 %v3338_v44  ;;  %v3339_v33 = vunpack.i.l.bf16 %v3338_v44  ;;  %v3376_v38 = vpop.eup %3375 }
 0x4ea   : > { %v3335_v34 = vunpack.i.h.bf16 %v3333_v30  ;;  %v3334_v35 = vunpack.i.l.bf16 %v3333_v30  ;;  %v3378_v41 = vpop.eup %3377  ;;  %v1375_v46 = vmul.f32 %v3376_v38, %v3760_v51  ;;  %v2763_v38 = vld [vmem:[%s3632_s16 + $0x20] sm:$0xff]  }
 0x4eb   : > { %2974 = vmatprep.mubr.msk.f32.mxu0 %vm1293_vm2, %v1378_v31  ;;  %v3167_v42 = vpack.c.bf16 %v3340_v32, %v3339_v33  ;;  %v3380_v45 = vpop.eup %3379  ;;  %v1376_v52 = vmul.f32 %v3378_v41, %v3769_v6  ;;  %v2766_v41 = vld [vmem:[%s3632_s16 + $0x38] sm:$0xff]  }
 0x4ec   : > { %v3163_v36 = vpack.c.bf16 %v3335_v34, %v3334_v35  ;;  %v3343_v37 = vpop.permute.xlu1 %3342  ;;  %v3382_v48 = vpop.eup %3381  ;;  %v1379_v54 = vmul.f32 %v3380_v45, %v3773_v11 }
 0x4ed   : > { %v3345_v39 = vunpack.i.h.bf16 %v3343_v37  ;;  %v3344_v40 = vunpack.i.l.bf16 %v3343_v37  ;;  %v1377_v51 = vmul.f32 %v3382_v48, %v3765_v62  ;;  %v2762_v37 = vld [vmem:[%s3632_s16 + $0x18] sm:$0xff]  }
 0x4ee   : > { %3164 = vmatprep.subr.bf16.mxu1 %v3163_v36 }
 0x4ef   : > { %v3171_v43 = vpack.c.bf16 %v3345_v39, %v3344_v40  ;;  %3166 = vmatpush3.bf16.msra.mxu1 %v3163_v36  ;;  %v2761_v36 = vld [vmem:[%s3632_s16 + $0x10] sm:$0xff]   ;;  %v2764_v39 = vld [vmem:[%s3632_s16 + $0x28] sm:$0xff]  }
 0x4f0   : > { %v3348_v47 = vpop.permute.xlu1 %3347  ;;  %3168 = vmatprep.subr.bf16.mxu1 %v3167_v42  ;;  %v3384_v53 = vpop.eup %3383  ;;  %v2765_v40 = vld [vmem:[%s3632_s16 + $0x30] sm:$0xff]  }
 0x4f1   : > { %v3350_v49 = vunpack.i.h.bf16 %v3348_v47  ;;  %v3349_v50 = vunpack.i.l.bf16 %v3348_v47  ;;  %3172 = vmatprep.subr.bf16.mxu0 %v3171_v43  ;;  %v3386_v56 = vpop.eup %3385  ;;  %v1380_v57 = vmul.f32 %v3384_v53, %v3780_v16  ;;  %v2596_v53 = vld [vmem:[%s3975_s30] ss:$0 sm:$0xff] }
 0x4f2   : > { %2961 = vmatmul.mubr.msk.f32.vlgmr.msra.gmra.mrb[8].mxu1 %vm1293_vm2, %v1375_v46  ;;  %3174 = vmatpush3.bf16.msra.mxu0 %v3171_v43  ;;  %v1381_v58 = vmul.f32 %v3386_v56, %v3778_v15 }
 0x4f3   : > { %v3175_v55 = vpack.c.bf16 %v3350_v49, %v3349_v50  ;;  %3170 = vmatpush3.bf16.msra.mxu1 %v3167_v42  ;;  %2967 = vmatprep.mubr.msk.f32.mxu1 %vm1293_vm2, %v1376_v52  ;;  %v2595_v50 = vld [vmem:[%s3974_s17] ss:$0 sm:$0xff] }
 0x4f4   : > { %3180 = vmatprep.subr.bf16.mxu0 %v2649_v59 }
 0x4f5   : > { %2975 = vmatmul.mubr.msk.f32.vlgmr.msra.gmra.mrb[2].mxu0 %vm1293_vm2, %v1379_v54  ;;  %3176 = vmatprep.subr.bf16.mxu1 %v3175_v55 }
 0x4f6   : > { %2968 = vmatmul.mubr.msk.f32.vlgmr.msra.gmra.mrb[10].mxu1 %vm1293_vm2, %v1377_v51  ;;  %3182 = vmatpush3.bf16.msra.mxu0 %v2649_v59  ;;  %v2689_v59 = vld [vmem:[%s3641_s25] sm:$0xff]  }
 0x4f7   : > { %3178 = vmatpush3.bf16.msra.mxu1 %v3175_v55  ;;  %2981 = vmatprep.mubr.msk.f32.mxu1 %vm1293_vm2, %v1380_v57 }
 0x4f8   : > { %3184 = vmatprep.subr.bf16.mxu0 %v2759_v60  ;;  %3188 = vmatprep.subr.bf16.mxu1 %v2657_v27 }
 0x4fa   : > { %2982 = vmatmul.mubr.msk.f32.vlgmr.msra.gmra.mrb[12].mxu1 %vm1293_vm2, %v1381_v58  ;;  %3186 = vmatpush3.bf16.msra.mxu0 %v2759_v60  ;;  %v2767_v60 = vld [vmem:[%s3641_s25 + $0x8] sm:$0xff]  }
 0x4fb   : > { %3190 = vmatpush3.bf16.msra.mxu1 %v2657_v27  ;;  %3220 = vmatprep.subr.bf16.mxu0 %v2689_v59 }
 0x4fc   : > { %3192 = vmatprep.subr.bf16.mxu1 %v2760_v28 }
 0x4ff   : > { %3194 = vmatpush3.bf16.msra.mxu1 %v2760_v28 }
 0x500   : > { %3196 = vmatprep.subr.bf16.mxu1 %v2761_v36 }
 0x503   : > { %3198 = vmatpush3.bf16.msra.mxu1 %v2761_v36 }
 0x504   : > { %3200 = vmatprep.subr.bf16.mxu1 %v2762_v37 }
 0x507   : > { %3202 = vmatpush3.bf16.msra.mxu1 %v2762_v37  ;;  %v3472_v37 = vmov (!%p2601_p10), 0.0|0.0  }
 0x508   : > { %3204 = vmatprep.subr.bf16.mxu1 %v2763_v38 }
 0x50b   : > { %3206 = vmatpush3.bf16.msra.mxu1 %v2763_v38  ;;  %v3474_v38 = vmov (!%p2601_p10), 0.0  }
 0x50c   : > { %3208 = vmatprep.subr.bf16.mxu1 %v2764_v39 }
 0x50f   : > { %3210 = vmatpush3.bf16.msra.mxu1 %v2764_v39  ;;  %v2721_v39 = vld [vmem:[%s3977_s28] sm:$0xff] (!%p2601_p10)  }
 0x510   : > { %3212 = vmatprep.subr.bf16.mxu1 %v2765_v40 }
 0x513   : > { %3214 = vmatpush3.bf16.msra.mxu1 %v2765_v40  ;;  %v2775_v40 = vld [vmem:[%s3977_s28 + $0x10] sm:$0xff] (!%p2601_p10)  }
 0x514   : > { %3216 = vmatprep.subr.bf16.mxu1 %v2766_v41 }
 0x517   : > { %3218 = vmatpush3.bf16.msra.mxu1 %v2766_v41  ;;  %v2776_v41 = vld [vmem:[%s3977_s28 + $0x18] sm:$0xff] (!%p2601_p10)  }
 0x518   : > { %3254 = vmatprep.subr.bf16.mxu1 (!%p2601_p10), %v3472_v37 }
 0x5c5   : > { %v2962_v61 = vpop.f32.mrb[8].mxu1 }
 0x5c6   : > { %v1460_v62 = vpop.f32.mrb[9].mxu1 }
 0x5c8   : > { %v2976_v63 = vpop.f32.mrb[2].mxu0 }
 0x5c9   : > { %v2969_v0 = vpop.f32.mrb[10].mxu1  ;;  %v1634_v1 = vpop.f32.mrb[3].mxu0 }
 0x5ca   : > { %1734 = vrot.lane.b32.xlu1 %v2969_v0, %s3469_s20  ;;  %v1547_v4 = vpop.f32.mrb[11].mxu1  ;;  %v2771_v0 = vld [vmem:[%s3641_s25 + $0x28] sm:$0xff]  }
 0x5cb   : > { %1732 = vrot.lane.b32.xlu0 %v1547_v4, %s3469_s20  ;;  %v2773_v4 = vld [vmem:[%s3641_s25 + $0x38] sm:$0xff]   ;;  %s3978_s20 = sld [smem:[#allocation17_spill]] (!%p2601_p10) }
 0x5cd   : > { %v2983_v5 = vpop.f32.mrb[12].mxu1 }
 0x5ce   : > { %1742 = vrot.lane.b32.xlu1 %v2976_v63, %s3470_s22  ;;  %v1721_v6 = vpop.f32.mrb[13].mxu1  ;;  %v2770_v63 = vld [vmem:[%s3641_s25 + $0x20] sm:$0xff]  }
 0x5cf   : > { %1740 = vrot.lane.b32.xlu0 %v1634_v1, %s3470_s22  ;;  %v2772_v1 = vld [vmem:[%s3641_s25 + $0x30] sm:$0xff]  }
 0x5d2   : > { %1750 = vrot.lane.b32.xlu1 %v2983_v5, %s3471_s23  ;;  %v2597_v5 = vld [vmem:[%s732_s8] ss:$0 sm:$0xff]  ;;  %s2202_s8 = sld [smem:[#allocation4]] (!%p2601_p10) }
 0x5d3   : > { %1748 = vrot.lane.b32.xlu0 %v1721_v6, %s3471_s23 }
 0x63c   : > { %v1735_v7 = vpop.permute.xlu1 %1734 }
 0x63d   : > { %v1733_v9 = vpop.permute.xlu0 %1732  ;;  %v1755_v14 = vsel %vm920_vm0, %v2962_v61, %v1735_v7  ;;  %v2768_v61 = vld [vmem:[%s3641_s25 + $0x10] sm:$0xff]  }
 0x63e   : > { %v1754_v12 = vsel %vm920_vm0, %v1460_v62, %v1733_v9  ;;  %v2769_v62 = vld [vmem:[%s3641_s25 + $0x18] sm:$0xff]   ;;  %s2605_s25 = sld [smem:[#allocation4 + $0x1]] (!%p2601_p10) }
 0x640   : > { %v1743_v10 = vpop.permute.xlu1 %1742 }
 0x641   : > { %v1741_v11 = vpop.permute.xlu0 %1740  ;;  %v1757_v17 = vsel %vm1293_vm2, %v1755_v14, %v1743_v10 }
 0x642   : > { %v1756_v15 = vsel %vm1293_vm2, %v1754_v12, %v1741_v11 }
 0x644   : > { %v1751_v13 = vpop.permute.xlu1 %1750 }
 0x645   : > { %v1749_v16 = vpop.permute.xlu0 %1748  ;;  %v1760_v19 = vsel %vm1758_vm3, %v1757_v17, %v1751_v13 }
 0x646   : > { %v1759_v18 = vsel %vm1758_vm3, %v1756_v15, %v1749_v16 }
 0x647   : > { %2992 = vmatprep.mubr.msk.f32.mxu0 %vm1769_vm4, %v1759_v18 }
 0x648   : > { %2993 = vmatmul.mubr.msk.f32.vlgmr.msra.gmra.mrb[4].mxu0 %vm1769_vm4, %v1760_v19 }
 0x649   : > { %3222 = vmatpush3.bf16.msra.mxu0 %v2689_v59  ;;  %v2203_v59 = vstv (!%p2601_p10), %s2202_s8 }
 0x64a   : > { %3224 = vmatprep.subr.bf16.mxu0 %v2767_v60 }
 0x64d   : > { %3226 = vmatpush3.bf16.msra.mxu0 %v2767_v60  ;;  %v2208_v60 = vstv (!%p2601_p10), %s2605_s25 }
 0x64e   : > { %3228 = vmatprep.subr.bf16.mxu0 %v2768_v61 }
 0x651   : > { %3230 = vmatpush3.bf16.msra.mxu0 %v2768_v61 }
 0x652   : > { %3232 = vmatprep.subr.bf16.mxu0 %v2769_v62 }
 0x655   : > { %3234 = vmatpush3.bf16.msra.mxu0 %v2769_v62 }
 0x656   : > { %3236 = vmatprep.subr.bf16.mxu0 %v2770_v63 }
 0x659   : > { %3238 = vmatpush3.bf16.msra.mxu0 %v2770_v63  ;;  %v2603_v63 = vld [vmem:[%s3979_s19] ss:$0 sm:$0xff] (!%p2601_p10) }
 0x65a   : > { %3240 = vmatprep.subr.bf16.mxu0 %v2771_v0 }
 0x65d   : > { %3242 = vmatpush3.bf16.msra.mxu0 %v2771_v0 }
 0x65e   : > { %3244 = vmatprep.subr.bf16.mxu0 %v2772_v1 }
 0x661   : > { %3246 = vmatpush3.bf16.msra.mxu0 %v2772_v1 }
 0x662   : > { %3248 = vmatprep.subr.bf16.mxu0 %v2773_v4 }
 0x665   : > { %3250 = vmatpush3.bf16.msra.mxu0 %v2773_v4 }
 0x666   : > { %3251 = vmatprep.subr.bf16.mxu0 (!%p2601_p10), %v3472_v37 }
 0x71b   : > { %v2994_v20 = vpop.f32.mrb[4].mxu0 }
 0x71c   : > { %v1852_v22 = vadd.f32 %v2994_v20, %v3657_v3  ;;  %v1842_v23 = vpop.f32.mrb[5].mxu0 }
 0x71d   : > { %v1851_v24 = vadd.f32 %v1842_v23, %v3654_v2 }
 0x71e   : > { %v3817_v25 = vadd.f32 %v2594_v21, %v1852_v22 }
 0x71f   : > { %v3819_v26 = vadd.f32 %v2594_v21, %v1851_v24  ;;  %v2600_v24 = vld [vmem:[%s740_s29] ss:$0 sm:$0xff] }
 0x720   : > { %1866 = vadd.xlane.f32.xlu1 %v3817_v25 }
 0x721   : > { %1864 = vadd.xlane.f32.xlu0 %v3819_v26 }
 0x7ad   : > { %v1867_v3 = vpop.xlane.xlu1 %1866 }
 0x7ae   : > { %v1869_v29 = vmul.f32 0.03125, %v1867_v3  ;;  %v1865_v44 = vpop.xlane.xlu0 %1864 }
 0x7af   : > { %v1868_v2 = vmul.f32 0.03125, %v1865_v44 }
 0x7b0   : > { %v1871_v30 = vsub.f32 %v3817_v25, %v1869_v29 }
 0x7b1   : > { %v1870_v31 = vsub.f32 %v3819_v26, %v1868_v2 }
 0x7b2   : > { %v1873_v34 = vmul.f32 %v3665_v8, %v1871_v30 }
 0x7b3   : > { %v1872_v32 = vmul.f32 %v3665_v8, %v1870_v31 }
 0x7b4   : > { %v1875_v35 = vmul.f32 %v1873_v34, %v1873_v34 }
 0x7b5   : > { %v1874_v33 = vmul.f32 %v1872_v32, %v1872_v32 }
 0x7b7   : > { %1876 = vadd.xlane.f32.xlu0 %v1874_v33 }
 0x7bb   : > { %1878 = vadd.xlane.f32.xlu0 %v1875_v35 }
 0x844   : > { %v1877_v42 = vpop.xlane.xlu0 %1876 }
 0x845   : > { %v1880_v43 = vmul.f32 0.03125, %v1877_v42  ;;  %v2777_v42 = vld [vmem:[%s3977_s28 + $0x20] sm:$0xff] (!%p2601_p10)  }
 0x847   : > { %v1882_v45 = vadd.f32 1e-05, %v1880_v43  ;;  %v2778_v43 = vld [vmem:[%s3977_s28 + $0x28] sm:$0xff] (!%p2601_p10)  }
 0x848   : > { %v1879_v46 = vpop.xlane.xlu0 %1878 }
 0x849   : > { %3387 = vrsqrt.f32 %v1882_v45  ;;  %v1881_v47 = vmul.f32 0.03125, %v1879_v46  ;;  %v2779_v45 = vld [vmem:[%s3977_s28 + $0x30] sm:$0xff] (!%p2601_p10)   ;;  %v2780_v46 = vld [vmem:[%s3977_s28 + $0x38] sm:$0xff] (!%p2601_p10)  }
 0x84b   : > { %v1883_v48 = vadd.f32 1e-05, %v1881_v47 }
 0x84d   : > { %3389 = vrsqrt.f32 %v1883_v48 }
 0x853   : > { %v3388_v49 = vpop.eup %3387 }
 0x854   : > { %v1886_v52 = vmul.f32 %v3388_v49, %v1872_v32 }
 0x856   : > { %v1894_v54 = vmul.f32 %v2595_v50, %v1886_v52 }
 0x857   : > { %v3390_v55 = vpop.eup %3389 }
 0x858   : > { %v1887_v51 = vmul.f32 %v3390_v55, %v1873_v34  ;;  %v1902_v56 = vadd.f32 %v2596_v53, %v1894_v54  ;;  %v2200_v54 = vlaneseq (!%p2601_p10) }
 0x85a   : > { %v1895_v57 = vmul.f32 %v2595_v50, %v1887_v51  ;;  %3027 = vmatprep.mubr.f32.mxu1 %v1902_v56  ;;  %v2602_v56 = vld [vmem:[%s3978_s20] ss:$0 sm:$0xff] (!%p2601_p10) }
 0x85c   : > { %v1903_v58 = vadd.f32 %v2596_v53, %v1895_v57  ;;  %v2201_v57 = vand.u32 (!%p2601_p10), 127, %v2200_v54 }
 0x85e   : > { %3028 = vmatmul.mubr.f32.vlgmr.msra.gmra.mrb[14].mxu1 %v1903_v58  ;;  %vm2204_vm6 = vcmp.eq.s32.totalorder (!%p2601_p10), %v2201_v57, %v2203_v59  ;;  %vm2209_vm7 = vcmp.eq.s32.totalorder (!%p2601_p10), %v2201_v57, %v2208_v60 }
 0x85f   : > { %3104 = vmatprep.mubr.msk.f32.mxu1 (!%p2601_p10), %vm3473_vm5, %v3474_v38  ;;  %3256 = vmatpush3.bf16.msra.mxu1 (!%p2601_p10), %v2721_v39 }
 0x860   : > { %3257 = vmatprep.subr.bf16.mxu1 (!%p2601_p10), %v3472_v37 }
 0x931   : > { %v3029_v6 = vpop.f32.mrb[14].mxu1 }
 0x932   : > { %v2015_v7 = vadd.f32 %v3029_v6, %v2597_v5  ;;  %v2009_v9 = vpop.f32.mrb[15].mxu1  ;;  %v2606_v6 = vsel (!%p2601_p10), %vm2209_vm7, 1.0, %v3474_v38 }
 0x933   : > { %v2010_v10 = vadd.f32 %v2597_v5, %v2009_v9  ;;  %v2604_v5 = vsel (!%p2601_p10), %vm2204_vm6, 1.0, %v3474_v38 }
 0x934   : > { %v2599_v11 = vmul.f32 -1.702, %v2015_v7  ;;  %v2213_v9 = vsel (!%p2601_p10), %vm2212_vm8, %v2604_v5, %v2606_v6 }
 0x935   : > { %v2598_v12 = vmul.f32 -1.702, %v2010_v10 }
 0x936   : > { %v2024_v13 = vmul.f32 1.442695, %v2599_v11 }
 0x937   : > { %v2022_v14 = vmul.f32 1.442695, %v2598_v12 }
 0x938   : > { %3391 = vpow2.f32 %v2024_v13 }
 0x939   : > { %3393 = vpow2.f32 %v2022_v14 }
 0x942   : > { %v3392_v15 = vpop.eup %3391 }
 0x943   : > { %v3394_v16 = vpop.eup %3393  ;;  %v2027_v17 = vadd.f32 1.0, %v3392_v15 }
 0x944   : > { %v2026_v18 = vadd.f32 1.0, %v3394_v16 }
 0x945   : > { %3395 = vrcp.f32 %v2027_v17 }
 0x946   : > { %3397 = vrcp.f32 %v2026_v18 }
 0x94f   : > { %v3396_v19 = vpop.eup %3395 }
 0x950   : > { %v3398_v20 = vpop.eup %3397  ;;  %v2033_v22 = vmul.f32 %v3396_v19, %v2015_v7 }
 0x951   : > { %v2032_v21 = vmul.f32 %v3398_v20, %v2010_v10 }
 0x953   : > { %3062 = vmatprep.mubr.f32.mxu0 %v2032_v21 }
 0x954   : > { %3063 = vmatmul.mubr.f32.vlgmr.msra.gmra.mrb[6].mxu0 %v2033_v22 }
 0x955   : > { %3069 = vmatprep.mubr.msk.f32.mxu0 (!%p2601_p10), %vm3473_vm5, %v3474_v38 }
 0xa27   : > { %v3064_v23 = vpop.f32.mrb[6].mxu0  ;;  %2157 = sbr.rel (%p2601_p10) target bundleno = 3510 (0xdb6), region = 100 }
 0xa28   : > { %v2142_v27 = vadd.f32 %v3064_v23, %v3817_v25  ;;  %v2132_v28 = vpop.f32.mrb[7].mxu0 }
 0xa29   : > { %v2141_v3 = vadd.f32 %v2132_v28, %v3819_v26 }
 0xa2a   : > { %v2151_v29 = vadd.f32 %v2600_v24, %v2142_v27 }
 0xa2b   : > { %v2150_v44 = vadd.f32 %v2600_v24, %v2141_v3 }
 0xa2c   : > { %2153 = vst [vmem:[#allocation2 + $0x8] sm:$0xff] %v2151_v29 }
 0xa2d   : > { %2152 = vst [vmem:[#allocation2] sm:$0xff] %v2150_v44  ;;  %2160 = vadd.xlane.f32.xlu0 (!%p2601_p10), %v2150_v44 }
 0xa31   : > { %2162 = vadd.xlane.f32.xlu0 %v2151_v29 }
 0xaba   : > { %v2161_v2 = vpop.xlane.xlu0 %2160 }
 0xabb   : > { %v2164_v30 = vmul.f32 0.03125, %v2161_v2 }
 0xabd   : > { %v2166_v31 = vsub.f32 %v2150_v44, %v2164_v30 }
 0xabe   : > { %v2163_v32 = vpop.xlane.xlu0 %2162 }
 0xabf   : > { %v2168_v33 = vmul.f32 %v3665_v8, %v2166_v31  ;;  %v2165_v34 = vmul.f32 0.03125, %v2163_v32 }
 0xac1   : > { %v2167_v25 = vsub.f32 %v2151_v29, %v2165_v34  ;;  %v2170_v35 = vmul.f32 %v2168_v33, %v2168_v33 }
 0xac3   : > { %v2169_v26 = vmul.f32 %v3665_v8, %v2167_v25  ;;  %2172 = vadd.xlane.f32.xlu1 %v2170_v35  ;;  %v2774_v8 = vld [vmem:[%s3977_s28 + $0x8] sm:$0xff]  }
 0xac4   : > { %3259 = vmatpush3.bf16.msra.mxu1 %v2774_v8 }
 0xac5   : > { %v2171_v36 = vmul.f32 %v2169_v26, %v2169_v26  ;;  %3260 = vmatprep.subr.bf16.mxu1 %v3472_v37 }
 0xac7   : > { %2174 = vadd.xlane.f32.xlu1 %v2171_v36 }
 0xac8   : > { %3262 = vmatpush3.bf16.msra.mxu1 %v2775_v40 }
 0xac9   : > { %3263 = vmatprep.subr.bf16.mxu1 %v3472_v37 }
 0xacc   : > { %3265 = vmatpush3.bf16.msra.mxu1 %v2776_v41 }
 0xacd   : > { %3266 = vmatprep.subr.bf16.mxu1 %v3472_v37 }
 0xad0   : > { %3268 = vmatpush3.bf16.msra.mxu1 %v2777_v42 }
 0xad1   : > { %3269 = vmatprep.subr.bf16.mxu1 %v3472_v37 }
 0xad4   : > { %3271 = vmatpush3.bf16.msra.mxu1 %v2778_v43 }
 0xad5   : > { %3272 = vmatprep.subr.bf16.mxu1 %v3472_v37 }
 0xad8   : > { %3274 = vmatpush3.bf16.msra.mxu1 %v2779_v45 }
 0xad9   : > { %3275 = vmatprep.subr.bf16.mxu1 %v3472_v37 }
 0xadc   : > { %3277 = vmatpush3.bf16.msra.mxu1 %v2780_v46 }
 0xb50   : > { %v2173_v47 = vpop.xlane.xlu1 %2172 }
 0xb51   : > { %v2176_v48 = vmul.f32 0.03125, %v2173_v47 }
 0xb53   : > { %v2178_v49 = vadd.f32 1e-05, %v2176_v48 }
 0xb54   : > { %v2175_v50 = vpop.xlane.xlu1 %2174 }
 0xb55   : > { %3399 = vrsqrt.f32 %v2178_v49  ;;  %v2177_v52 = vmul.f32 0.03125, %v2175_v50 }
 0xb57   : > { %v2179_v53 = vadd.f32 1e-05, %v2177_v52 }
 0xb59   : > { %3401 = vrsqrt.f32 %v2179_v53 }
 0xb5f   : > { %v3400_v55 = vpop.eup %3399 }
 0xb60   : > { %v2182_v51 = vmul.f32 %v3400_v55, %v2168_v33 }
 0xb62   : > { %v2190_v62 = vmul.f32 %v2602_v56, %v2182_v51 }
 0xb63   : > { %v3402_v58 = vpop.eup %3401 }
 0xb64   : > { %v2183_v61 = vmul.f32 %v3402_v58, %v2169_v26  ;;  %v2198_v1 = vadd.f32 %v2603_v63, %v2190_v62 }
 0xb66   : > { %v2191_v0 = vmul.f32 %v2602_v56, %v2183_v61 }
 0xb68   : > { %v2199_v4 = vadd.f32 %v2603_v63, %v2191_v0 }
 0xb6a   : > { %v3252_v7 = vpack.c.bf16 %v2199_v4, %v2198_v1 }
 0xb6c   : > { %3253 = vmatpush3.bf16.msra.mxu0 %v3252_v7 }
 0xb6f   : > { %3070 = vmatmul.mubr.msk.f32.vlgmr.msra.gmra.mrb[0].mxu0 %vm1293_vm2, %v2213_v9 }
 0xc42   : > { %v2283_v10 = vpop.f32.mrb[0].mxu0 }
 0xc43   : > { %v3071_v11 = vpop.f32.mrb[1].mxu0  ;;  %3105 = vmatmul.mubr.f32.vlgmr.msra.gmra.mrb[0].mxu1 %v2283_v10 }
 0xd16   : > { %v2385_v12 = vpop.f32.mrb[0].mxu1 }
 0xd17   : > { %v2389_v13 = vmul.f32 %v2385_v12, %v2385_v12  ;;  %v3106_v14 = vpop.f32.mrb[1].mxu1 }
 0xd19   : > { %v2391_v15 = vsel %vm2390_vm9, %v2389_v13, 0.0 }
 0xd1a   : > { %2392 = vadd.xlane.f32.xlu0 %v2391_v15 }
 0xda7   : > { %v2393_v16 = vpop.xlane.xlu0 %2392 }
 0xda8   : > { %3403 = vrsqrt.f32 %v2393_v16 }
 0xdb2   : > { %v3404_v17 = vpop.eup %3403 }
 0xdb3   : > { %v2395_v18 = vmul.f32 %v3404_v17, %v2385_v12 }
 0xdb5   : > { %2396 = vst [vmem:[#allocation5] sm:$0x3] %v2395_v18 }
 0xdb6 PF: > { %p3282_p11 = scmp.eq.s32.totalorder %s3585_s2, 1  ;;  %s3475_s24 = smov [#allocation5]  }
 0xdb7   : > { %s2404_s3 = sshll.u32 %s3475_s24, 4  ;;  %s2405_s3 = int_to_ptr.vmem [resolvable:$true] %s2404_s3 }
 0xdb8   : > { %s3417_s1 = scalar_lea.vmem %s2405_s3, 32  ;;  %p3424_p1 = scmp.lt.s32.totalorder %s2405_s3, %s2405_s3 }
 0xdb9   : > { %p3418_p12 = scmp.ne.s32.totalorder %s2405_s3, %s3417_s1  ;;  %p3425_p2 = scmp.lt.s32.totalorder %s3417_s1, %s3417_s1 }
 0xdbb   : > { %p3419_p13 = pnand %p3418_p12, %p3282_p11  ;;  %p3426_p3 = por %p3425_p2, %p3424_p1 }
 0xdbd   : > { %p3420_p0 = pneg %p3419_p13 }
 0xdbf   : > { %p3427_p4 = pnand %p3426_p3, %p3420_p0 }
 0xdc1   : > { %3430 = shalt.err (!%p3427_p4)
}
 0xdc2   : > { %s3980_s26 = sld [smem:[#allocation20_spill]] }
 0xdc8   : > { %s3431_s30 = scalar_lea.hbm %s3980_s26, 32 }
 0xdc9   : > { %p3432_p5 = scmp.ne.s32.totalorder %s3980_s26, %s3431_s30  ;;  %p3437_p8 = scmp.lt.u32.totalorder %s3431_s30, %s3980_s26 }
 0xdcb   : > { %p3433_p6 = pnand %p3432_p5, %p3282_p11 }
 0xdcd   : > { %p3434_p7 = pneg %p3433_p6 }
 0xdcf   : > { %p3439_p9 = pnand %p3437_p8, %p3434_p7 }
 0xdd1   : > { %3442 = shalt.err (!%p3439_p9)
}
 0xdd2   : > { %3279 = dma.vmem_to_hbm [thread:$0]  (%p3282_p11), %s2405_s3, 32, %s3980_s26, [#allocation6]  }
 0xdd3   : > { %3450 = dma.done.wait (%p3282_p11), [#allocation6], 32  }
 0xdd4   : > { %3452 = vsyncadd (%p3282_p11), [#allocation6], 4294967264 }
 0xdd5 PF: > { %s3981_s29 = sld [smem:[#allocation9_spill]] }
 0xddb   : > { %s36_s22 = sadd.s32 1, %s3981_s29  }
 0xddc   : > { %p33_p10 = scmp.ge.s32.totalorder %s36_s22, 4  }
 0xdde   :  { %35 = sbr.rel (!%p33_p10) target bundleno = 25 (0x19), region = 160 }
 0xde5   :  { %2417 = vsyncpa [#allocation6], 1 }
 0xde6   :  { %2419 = vsyncpa [#allocation6 + $0x1], 1 }

</bundles_post_ra>
